<compile_context>
chip_gen: v7x
topology: tpu7x:2x2x1
jax: 0.10.0
libtpu: 0.0.40
codegen_flags: <defaults>
</compile_context>

<pallas_src>
import functools

import jax
import jax.numpy as jnp
from jax.experimental import pallas as pl
from jax.experimental.pallas import tpu as pltpu

# Model hyperparameters (from the PyTorch module)
INPUT_SIZE = 48
HIDDEN_SIZE = 32
NUM_LAYERS = 3
NUM_CLASSES = 1

# Small example shapes
BATCH = 2
SEQ = 8


def _lstm_fc_kernel(num_layers, hidden_size, batch, seq, *refs):
    """refs = (x2d, [w_ih_T, w_hh_T, b] * num_layers, fc_w_T, fc_b, out, h_scratch).

    x2d is time-major: row t*B + b  ==  x[b, t, :].
    """
    x_ref = refs[0]
    layer_refs = refs[1 : 1 + 3 * num_layers]
    fc_w_ref = refs[1 + 3 * num_layers]
    fc_b_ref = refs[2 + 3 * num_layers]
    out_ref = refs[3 + 3 * num_layers]
    h_scratch = refs[4 + 3 * num_layers]          # (T*B, H) VMEM, time-major

    H = hidden_size
    B = batch
    T = seq

    layer_in = x_ref[...].astype(jnp.float32)     # (T*B, D_in) time-major slab
    h = jnp.zeros((B, H), jnp.float32)

    for layer in range(num_layers):
        w_ih_t = layer_refs[3 * layer + 0][...]   # (D_in_layer, 4H)
        w_hh_t = layer_refs[3 * layer + 1][...]   # (H, 4H)
        b = layer_refs[3 * layer + 2][...]        # (1, 4H) == b_ih + b_hh

        # Batched input projection + bias, hoisted off the serial recurrence:
        # one MXU push for all T timesteps of this layer.
        pre = jnp.dot(layer_in, w_ih_t, preferred_element_type=jnp.float32) + b  # (T*B, 4H)

        h = jnp.zeros((B, H), jnp.float32)
        c = jnp.zeros((B, H), jnp.float32)
        last_layer = layer == num_layers - 1

        for t in range(T):
            if t == 0:
                # h0 == 0, so h @ w_hh contributes nothing: skip the matmul.
                gates = pre[0:B, :]
            else:
                gates = pre[t * B : (t + 1) * B, :] + jnp.dot(
                    h, w_hh_t, preferred_element_type=jnp.float32
                )                                  # (B, 4H)

            # Activate the whole 128-lane gates tile at once (2 EUP passes).
            sig = jax.nn.sigmoid(gates)
            th = jnp.tanh(gates)
            # PyTorch gate order: input, forget, cell(g), output
            i_g = sig[:, 0 * H : 1 * H]
            f_g = sig[:, 1 * H : 2 * H]
            g_g = th[:, 2 * H : 3 * H]
            o_g = sig[:, 3 * H : 4 * H]

            c = f_g * c + i_g * g_g
            h = o_g * jnp.tanh(c)

            if not last_layer:
                # Flat time-major scratch slab; becomes next layer's input.
                h_scratch[pl.ds(t * B, B), :] = h

        if not last_layer:
            layer_in = h_scratch[...]              # (T*B, H)

    # fc on the last timestep of the top layer: out = h_last @ fc_w^T + fc_b
    fc_out = jnp.dot(h, fc_w_ref[...], preferred_element_type=jnp.float32) + fc_b_ref[...]
    out_ref[...] = fc_out.astype(out_ref.dtype)


def rnn_forward(x, params):
    """x: (B, T, INPUT_SIZE) float32. params: dict of LSTM + fc weights."""
    B, T, d_in = x.shape
    # Time-major 2-D slab: row t*B + b == x[b, t, :]. Done once in XLA (free).
    x2d = jnp.transpose(x, (1, 0, 2)).reshape(T * B, d_in)

    inputs = [x2d]
    for layer in range(NUM_LAYERS):
        w_ih, w_hh, b_ih, b_hh = params[f"layer{layer}"]
        inputs.append(jnp.asarray(w_ih).T)                        # (D_in, 4H)
        inputs.append(jnp.asarray(w_hh).T)                        # (H, 4H)
        inputs.append((b_ih + b_hh).reshape(1, 4 * HIDDEN_SIZE))  # (1, 4H)
    fc_w, fc_b = params["fc"]
    inputs.append(jnp.asarray(fc_w).T)                   # (H, C)
    inputs.append(jnp.asarray(fc_b).reshape(1, NUM_CLASSES))

    kernel = functools.partial(_lstm_fc_kernel, NUM_LAYERS, HIDDEN_SIZE, B, T)
    vmem = pltpu.MemorySpace.VMEM
    return pl.pallas_call(
        kernel,
        out_shape=jax.ShapeDtypeStruct((B, NUM_CLASSES), jnp.float32),
        in_specs=[pl.BlockSpec(memory_space=vmem)] * len(inputs),
        out_specs=pl.BlockSpec(memory_space=vmem),
        scratch_shapes=[pltpu.VMEM((T * B, HIDDEN_SIZE), jnp.float32)],
    )(*inputs)


def rnn_reference(x, params):
    """Pure-JAX reference mirroring torch.nn.LSTM + Linear semantics."""
    H = HIDDEN_SIZE
    layer_input = x
    h = None
    for layer in range(NUM_LAYERS):
        w_ih, w_hh, b_ih, b_hh = params[f"layer{layer}"]
        B, T, _ = layer_input.shape
        h = jnp.zeros((B, H), jnp.float32)
        c = jnp.zeros((B, H), jnp.float32)
        outs = []
        for t in range(T):
            g = layer_input[:, t, :] @ w_ih.T + h @ w_hh.T + b_ih + b_hh
            i_g = jax.nn.sigmoid(g[:, 0 * H : 1 * H])
            f_g = jax.nn.sigmoid(g[:, 1 * H : 2 * H])
            g_g = jnp.tanh(g[:, 2 * H : 3 * H])
            o_g = jax.nn.sigmoid(g[:, 3 * H : 4 * H])
            c = f_g * c + i_g * g_g
            h = o_g * jnp.tanh(c)
            outs.append(h)
        layer_input = jnp.stack(outs, axis=1)
    fc_w, fc_b = params["fc"]
    return h @ fc_w.T + fc_b


def init_params(key):
    """Deterministic init following PyTorch defaults: U(-1/sqrt(H), 1/sqrt(H))."""
    k = 1.0 / (HIDDEN_SIZE ** 0.5)
    params = {}
    for layer in range(NUM_LAYERS):
        d_in = INPUT_SIZE if layer == 0 else HIDDEN_SIZE
        key, k1, k2, k3, k4 = jax.random.split(key, 5)
        params[f"layer{layer}"] = (
            jax.random.uniform(k1, (4 * HIDDEN_SIZE, d_in), jnp.float32, -k, k),
            jax.random.uniform(k2, (4 * HIDDEN_SIZE, HIDDEN_SIZE), jnp.float32, -k, k),
            jax.random.uniform(k3, (4 * HIDDEN_SIZE,), jnp.float32, -k, k),
            jax.random.uniform(k4, (4 * HIDDEN_SIZE,), jnp.float32, -k, k),
        )
    key, k5, k6 = jax.random.split(key, 3)
    params["fc"] = (
        jax.random.uniform(k5, (NUM_CLASSES, HIDDEN_SIZE), jnp.float32, -k, k),
        jax.random.uniform(k6, (NUM_CLASSES,), jnp.float32, -k, k),
    )
    return params


if __name__ == "__main__":
    root = jax.random.PRNGKey(0)
    kx, kp = jax.random.split(root)
    x = jax.random.normal(kx, (BATCH, SEQ, INPUT_SIZE), jnp.float32)
    params = init_params(kp)

    out = jax.block_until_ready(rnn_forward(x, params))
    ref = jax.block_until_ready(rnn_reference(x, params))

    assert out.shape == (BATCH, NUM_CLASSES)
    assert jnp.allclose(out, ref, atol=1e-4, rtol=1e-4), (out, ref)
    print("KERNEL_OK")
</pallas_src>

<mosaic_0001>
module attributes {stable_mosaic.version = 11 : i64} {
  func.func @_lstm_fc_kernel(%arg0: memref<16x48xf32, #tpu.memory_space<vmem>>, %arg1: memref<48x128xf32, #tpu.memory_space<vmem>>, %arg2: memref<32x128xf32, #tpu.memory_space<vmem>>, %arg3: memref<1x128xf32, #tpu.memory_space<vmem>>, %arg4: memref<32x128xf32, #tpu.memory_space<vmem>>, %arg5: memref<32x128xf32, #tpu.memory_space<vmem>>, %arg6: memref<1x128xf32, #tpu.memory_space<vmem>>, %arg7: memref<32x128xf32, #tpu.memory_space<vmem>>, %arg8: memref<32x128xf32, #tpu.memory_space<vmem>>, %arg9: memref<1x128xf32, #tpu.memory_space<vmem>>, %arg10: memref<32x1xf32, #tpu.memory_space<vmem>>, %arg11: memref<1x1xf32, #tpu.memory_space<vmem>>, %arg12: memref<2x1xf32, #tpu.memory_space<vmem>>, %arg13: memref<16x32xf32, #tpu.memory_space<vmem>>) attributes {dimension_semantics = [], scalar_prefetch = 0 : i64, scratch_operands = 1 : i64, tpu.core_type = #tpu.core_type<tc>} {
    %c0 = arith.constant 0 : index
    %c0_0 = arith.constant 0 : index
    %0 = vector.load %arg0[%c0, %c0_0] : memref<16x48xf32, #tpu.memory_space<vmem>>, vector<16x48xf32>
    %c0_1 = arith.constant 0 : index
    %c0_2 = arith.constant 0 : index
    %1 = vector.load %arg1[%c0_1, %c0_2] : memref<48x128xf32, #tpu.memory_space<vmem>>, vector<48x128xf32>
    %c0_3 = arith.constant 0 : index
    %c0_4 = arith.constant 0 : index
    %2 = vector.load %arg2[%c0_3, %c0_4] : memref<32x128xf32, #tpu.memory_space<vmem>>, vector<32x128xf32>
    %c0_5 = arith.constant 0 : index
    %c0_6 = arith.constant 0 : index
    %3 = vector.load %arg3[%c0_5, %c0_6] : memref<1x128xf32, #tpu.memory_space<vmem>>, vector<1x128xf32>
    %cst = arith.constant dense<0.000000e+00> : vector<16x128xf32>
    %4 = tpu.matmul %0, %1, %cst {dimension_numbers = #tpu.dot_dimension_numbers<[1], [0], [0], [1], [0, 0, 1, 1], [], []>} : vector<16x48xf32>, vector<48x128xf32>, vector<16x128xf32> -> vector<16x128xf32>
    %5 = vector.broadcast %3 : vector<1x128xf32> to vector<16x128xf32>
    %6 = arith.addf %4, %5 : vector<16x128xf32>
    %cst_7 = arith.constant 0.000000e+00 : f32
    %7 = vector.broadcast %cst_7 : f32 to vector<2x32xf32>
    %8 = vector.extract_strided_slice %6 {offsets = [0, 0], sizes = [2, 128], strides = [1, 1]} : vector<16x128xf32> to vector<2x128xf32>
    %9 = arith.negf %8 : vector<2x128xf32>
    %10 = math.exp %9 : vector<2x128xf32>
    %cst_8 = arith.constant 1.000000e+00 : f32
    %11 = vector.broadcast %cst_8 : f32 to vector<2x128xf32>
    %12 = arith.addf %11, %10 : vector<2x128xf32>
    %13 = arith.divf %11, %12 : vector<2x128xf32>
    %14 = math.tanh %8 : vector<2x128xf32>
    %15 = vector.extract_strided_slice %13 {offsets = [0, 0], sizes = [2, 32], strides = [1, 1]} : vector<2x128xf32> to vector<2x32xf32>
    %16 = vector.extract_strided_slice %13 {offsets = [0, 32], sizes = [2, 32], strides = [1, 1]} : vector<2x128xf32> to vector<2x32xf32>
    %17 = vector.extract_strided_slice %14 {offsets = [0, 64], sizes = [2, 32], strides = [1, 1]} : vector<2x128xf32> to vector<2x32xf32>
    %18 = vector.extract_strided_slice %13 {offsets = [0, 96], sizes = [2, 32], strides = [1, 1]} : vector<2x128xf32> to vector<2x32xf32>
    %19 = arith.mulf %16, %7 : vector<2x32xf32>
    %20 = arith.mulf %15, %17 : vector<2x32xf32>
    %21 = arith.addf %19, %20 : vector<2x32xf32>
    %22 = math.tanh %21 : vector<2x32xf32>
    %23 = arith.mulf %18, %22 : vector<2x32xf32>
    %c0_9 = arith.constant 0 : index
    %c0_10 = arith.constant 0 : index
    %24 = vector.load %arg13[%c0_9, %c0_10] : memref<16x32xf32, #tpu.memory_space<vmem>>, vector<2x32xf32>
    tpu.vector_store %arg13[%c0_9, %c0_10], %23 {strides = array<i32>} : memref<16x32xf32, #tpu.memory_space<vmem>>, vector<2x32xf32>,
    %25 = vector.extract_strided_slice %6 {offsets = [2, 0], sizes = [2, 128], strides = [1, 1]} : vector<16x128xf32> to vector<2x128xf32>
    %cst_11 = arith.constant dense<0.000000e+00> : vector<2x128xf32>
    %26 = tpu.matmul %23, %2, %cst_11 {dimension_numbers = #tpu.dot_dimension_numbers<[1], [0], [0], [1], [0, 0, 1, 1], [], []>} : vector<2x32xf32>, vector<32x128xf32>, vector<2x128xf32> -> vector<2x128xf32>
    %27 = arith.addf %25, %26 : vector<2x128xf32>
    %28 = arith.negf %27 : vector<2x128xf32>
    %29 = math.exp %28 : vector<2x128xf32>
    %cst_12 = arith.constant 1.000000e+00 : f32
    %30 = vector.broadcast %cst_12 : f32 to vector<2x128xf32>
    %31 = arith.addf %30, %29 : vector<2x128xf32>
    %32 = arith.divf %30, %31 : vector<2x128xf32>
    %33 = math.tanh %27 : vector<2x128xf32>
    %34 = vector.extract_strided_slice %32 {offsets = [0, 0], sizes = [2, 32], strides = [1, 1]} : vector<2x128xf32> to vector<2x32xf32>
    %35 = vector.extract_strided_slice %32 {offsets = [0, 32], sizes = [2, 32], strides = [1, 1]} : vector<2x128xf32> to vector<2x32xf32>
    %36 = vector.extract_strided_slice %33 {offsets = [0, 64], sizes = [2, 32], strides = [1, 1]} : vector<2x128xf32> to vector<2x32xf32>
    %37 = vector.extract_strided_slice %32 {offsets = [0, 96], sizes = [2, 32], strides = [1, 1]} : vector<2x128xf32> to vector<2x32xf32>
    %38 = arith.mulf %35, %21 : vector<2x32xf32>
    %39 = arith.mulf %34, %36 : vector<2x32xf32>
    %40 = arith.addf %38, %39 : vector<2x32xf32>
    %41 = math.tanh %40 : vector<2x32xf32>
    %42 = arith.mulf %37, %41 : vector<2x32xf32>
    %c2 = arith.constant 2 : index
    %c0_13 = arith.constant 0 : index
    %43 = vector.load %arg13[%c2, %c0_13] : memref<16x32xf32, #tpu.memory_space<vmem>>, vector<2x32xf32>
    tpu.vector_store %arg13[%c2, %c0_13], %42 {strides = array<i32>} : memref<16x32xf32, #tpu.memory_space<vmem>>, vector<2x32xf32>,
    %44 = vector.extract_strided_slice %6 {offsets = [4, 0], sizes = [2, 128], strides = [1, 1]} : vector<16x128xf32> to vector<2x128xf32>
    %cst_14 = arith.constant dense<0.000000e+00> : vector<2x128xf32>
    %45 = tpu.matmul %42, %2, %cst_14 {dimension_numbers = #tpu.dot_dimension_numbers<[1], [0], [0], [1], [0, 0, 1, 1], [], []>} : vector<2x32xf32>, vector<32x128xf32>, vector<2x128xf32> -> vector<2x128xf32>
    %46 = arith.addf %44, %45 : vector<2x128xf32>
    %47 = arith.negf %46 : vector<2x128xf32>
    %48 = math.exp %47 : vector<2x128xf32>
    %cst_15 = arith.constant 1.000000e+00 : f32
    %49 = vector.broadcast %cst_15 : f32 to vector<2x128xf32>
    %50 = arith.addf %49, %48 : vector<2x128xf32>
    %51 = arith.divf %49, %50 : vector<2x128xf32>
    %52 = math.tanh %46 : vector<2x128xf32>
    %53 = vector.extract_strided_slice %51 {offsets = [0, 0], sizes = [2, 32], strides = [1, 1]} : vector<2x128xf32> to vector<2x32xf32>
    %54 = vector.extract_strided_slice %51 {offsets = [0, 32], sizes = [2, 32], strides = [1, 1]} : vector<2x128xf32> to vector<2x32xf32>
    %55 = vector.extract_strided_slice %52 {offsets = [0, 64], sizes = [2, 32], strides = [1, 1]} : vector<2x128xf32> to vector<2x32xf32>
    %56 = vector.extract_strided_slice %51 {offsets = [0, 96], sizes = [2, 32], strides = [1, 1]} : vector<2x128xf32> to vector<2x32xf32>
    %57 = arith.mulf %54, %40 : vector<2x32xf32>
    %58 = arith.mulf %53, %55 : vector<2x32xf32>
    %59 = arith.addf %57, %58 : vector<2x32xf32>
    %60 = math.tanh %59 : vector<2x32xf32>
    %61 = arith.mulf %56, %60 : vector<2x32xf32>
    %c4 = arith.constant 4 : index
    %c0_16 = arith.constant 0 : index
    %62 = vector.load %arg13[%c4, %c0_16] : memref<16x32xf32, #tpu.memory_space<vmem>>, vector<2x32xf32>
    tpu.vector_store %arg13[%c4, %c0_16], %61 {strides = array<i32>} : memref<16x32xf32, #tpu.memory_space<vmem>>, vector<2x32xf32>,
    %63 = vector.extract_strided_slice %6 {offsets = [6, 0], sizes = [2, 128], strides = [1, 1]} : vector<16x128xf32> to vector<2x128xf32>
    %cst_17 = arith.constant dense<0.000000e+00> : vector<2x128xf32>
    %64 = tpu.matmul %61, %2, %cst_17 {dimension_numbers = #tpu.dot_dimension_numbers<[1], [0], [0], [1], [0, 0, 1, 1], [], []>} : vector<2x32xf32>, vector<32x128xf32>, vector<2x128xf32> -> vector<2x128xf32>
    %65 = arith.addf %63, %64 : vector<2x128xf32>
    %66 = arith.negf %65 : vector<2x128xf32>
    %67 = math.exp %66 : vector<2x128xf32>
    %cst_18 = arith.constant 1.000000e+00 : f32
    %68 = vector.broadcast %cst_18 : f32 to vector<2x128xf32>
    %69 = arith.addf %68, %67 : vector<2x128xf32>
    %70 = arith.divf %68, %69 : vector<2x128xf32>
    %71 = math.tanh %65 : vector<2x128xf32>
    %72 = vector.extract_strided_slice %70 {offsets = [0, 0], sizes = [2, 32], strides = [1, 1]} : vector<2x128xf32> to vector<2x32xf32>
    %73 = vector.extract_strided_slice %70 {offsets = [0, 32], sizes = [2, 32], strides = [1, 1]} : vector<2x128xf32> to vector<2x32xf32>
    %74 = vector.extract_strided_slice %71 {offsets = [0, 64], sizes = [2, 32], strides = [1, 1]} : vector<2x128xf32> to vector<2x32xf32>
    %75 = vector.extract_strided_slice %70 {offsets = [0, 96], sizes = [2, 32], strides = [1, 1]} : vector<2x128xf32> to vector<2x32xf32>
    %76 = arith.mulf %73, %59 : vector<2x32xf32>
    %77 = arith.mulf %72, %74 : vector<2x32xf32>
    %78 = arith.addf %76, %77 : vector<2x32xf32>
    %79 = math.tanh %78 : vector<2x32xf32>
    %80 = arith.mulf %75, %79 : vector<2x32xf32>
    %c6 = arith.constant 6 : index
    %c0_19 = arith.constant 0 : index
    %81 = vector.load %arg13[%c6, %c0_19] : memref<16x32xf32, #tpu.memory_space<vmem>>, vector<2x32xf32>
    tpu.vector_store %arg13[%c6, %c0_19], %80 {strides = array<i32>} : memref<16x32xf32, #tpu.memory_space<vmem>>, vector<2x32xf32>,
    %82 = vector.extract_strided_slice %6 {offsets = [8, 0], sizes = [2, 128], strides = [1, 1]} : vector<16x128xf32> to vector<2x128xf32>
    %cst_20 = arith.constant dense<0.000000e+00> : vector<2x128xf32>
    %83 = tpu.matmul %80, %2, %cst_20 {dimension_numbers = #tpu.dot_dimension_numbers<[1], [0], [0], [1], [0, 0, 1, 1], [], []>} : vector<2x32xf32>, vector<32x128xf32>, vector<2x128xf32> -> vector<2x128xf32>
    %84 = arith.addf %82, %83 : vector<2x128xf32>
    %85 = arith.negf %84 : vector<2x128xf32>
    %86 = math.exp %85 : vector<2x128xf32>
    %cst_21 = arith.constant 1.000000e+00 : f32
    %87 = vector.broadcast %cst_21 : f32 to vector<2x128xf32>
    %88 = arith.addf %87, %86 : vector<2x128xf32>
    %89 = arith.divf %87, %88 : vector<2x128xf32>
    %90 = math.tanh %84 : vector<2x128xf32>
    %91 = vector.extract_strided_slice %89 {offsets = [0, 0], sizes = [2, 32], strides = [1, 1]} : vector<2x128xf32> to vector<2x32xf32>
    %92 = vector.extract_strided_slice %89 {offsets = [0, 32], sizes = [2, 32], strides = [1, 1]} : vector<2x128xf32> to vector<2x32xf32>
    %93 = vector.extract_strided_slice %90 {offsets = [0, 64], sizes = [2, 32], strides = [1, 1]} : vector<2x128xf32> to vector<2x32xf32>
    %94 = vector.extract_strided_slice %89 {offsets = [0, 96], sizes = [2, 32], strides = [1, 1]} : vector<2x128xf32> to vector<2x32xf32>
    %95 = arith.mulf %92, %78 : vector<2x32xf32>
    %96 = arith.mulf %91, %93 : vector<2x32xf32>
    %97 = arith.addf %95, %96 : vector<2x32xf32>
    %98 = math.tanh %97 : vector<2x32xf32>
    %99 = arith.mulf %94, %98 : vector<2x32xf32>
    %c8 = arith.constant 8 : index
    %c0_22 = arith.constant 0 : index
    %100 = vector.load %arg13[%c8, %c0_22] : memref<16x32xf32, #tpu.memory_space<vmem>>, vector<2x32xf32>
    tpu.vector_store %arg13[%c8, %c0_22], %99 {strides = array<i32>} : memref<16x32xf32, #tpu.memory_space<vmem>>, vector<2x32xf32>,
    %101 = vector.extract_strided_slice %6 {offsets = [10, 0], sizes = [2, 128], strides = [1, 1]} : vector<16x128xf32> to vector<2x128xf32>
    %cst_23 = arith.constant dense<0.000000e+00> : vector<2x128xf32>
    %102 = tpu.matmul %99, %2, %cst_23 {dimension_numbers = #tpu.dot_dimension_numbers<[1], [0], [0], [1], [0, 0, 1, 1], [], []>} : vector<2x32xf32>, vector<32x128xf32>, vector<2x128xf32> -> vector<2x128xf32>
    %103 = arith.addf %101, %102 : vector<2x128xf32>
    %104 = arith.negf %103 : vector<2x128xf32>
    %105 = math.exp %104 : vector<2x128xf32>
    %cst_24 = arith.constant 1.000000e+00 : f32
    %106 = vector.broadcast %cst_24 : f32 to vector<2x128xf32>
    %107 = arith.addf %106, %105 : vector<2x128xf32>
    %108 = arith.divf %106, %107 : vector<2x128xf32>
    %109 = math.tanh %103 : vector<2x128xf32>
    %110 = vector.extract_strided_slice %108 {offsets = [0, 0], sizes = [2, 32], strides = [1, 1]} : vector<2x128xf32> to vector<2x32xf32>
    %111 = vector.extract_strided_slice %108 {offsets = [0, 32], sizes = [2, 32], strides = [1, 1]} : vector<2x128xf32> to vector<2x32xf32>
    %112 = vector.extract_strided_slice %109 {offsets = [0, 64], sizes = [2, 32], strides = [1, 1]} : vector<2x128xf32> to vector<2x32xf32>
    %113 = vector.extract_strided_slice %108 {offsets = [0, 96], sizes = [2, 32], strides = [1, 1]} : vector<2x128xf32> to vector<2x32xf32>
    %114 = arith.mulf %111, %97 : vector<2x32xf32>
    %115 = arith.mulf %110, %112 : vector<2x32xf32>
    %116 = arith.addf %114, %115 : vector<2x32xf32>
    %117 = math.tanh %116 : vector<2x32xf32>
    %118 = arith.mulf %113, %117 : vector<2x32xf32>
    %c10 = arith.constant 10 : index
    %c0_25 = arith.constant 0 : index
    %119 = vector.load %arg13[%c10, %c0_25] : memref<16x32xf32, #tpu.memory_space<vmem>>, vector<2x32xf32>
    tpu.vector_store %arg13[%c10, %c0_25], %118 {strides = array<i32>} : memref<16x32xf32, #tpu.memory_space<vmem>>, vector<2x32xf32>,
    %120 = vector.extract_strided_slice %6 {offsets = [12, 0], sizes = [2, 128], strides = [1, 1]} : vector<16x128xf32> to vector<2x128xf32>
    %cst_26 = arith.constant dense<0.000000e+00> : vector<2x128xf32>
    %121 = tpu.matmul %118, %2, %cst_26 {dimension_numbers = #tpu.dot_dimension_numbers<[1], [0], [0], [1], [0, 0, 1, 1], [], []>} : vector<2x32xf32>, vector<32x128xf32>, vector<2x128xf32> -> vector<2x128xf32>
    %122 = arith.addf %120, %121 : vector<2x128xf32>
    %123 = arith.negf %122 : vector<2x128xf32>
    %124 = math.exp %123 : vector<2x128xf32>
    %cst_27 = arith.constant 1.000000e+00 : f32
    %125 = vector.broadcast %cst_27 : f32 to vector<2x128xf32>
    %126 = arith.addf %125, %124 : vector<2x128xf32>
    %127 = arith.divf %125, %126 : vector<2x128xf32>
    %128 = math.tanh %122 : vector<2x128xf32>
    %129 = vector.extract_strided_slice %127 {offsets = [0, 0], sizes = [2, 32], strides = [1, 1]} : vector<2x128xf32> to vector<2x32xf32>
    %130 = vector.extract_strided_slice %127 {offsets = [0, 32], sizes = [2, 32], strides = [1, 1]} : vector<2x128xf32> to vector<2x32xf32>
    %131 = vector.extract_strided_slice %128 {offsets = [0, 64], sizes = [2, 32], strides = [1, 1]} : vector<2x128xf32> to vector<2x32xf32>
    %132 = vector.extract_strided_slice %127 {offsets = [0, 96], sizes = [2, 32], strides = [1, 1]} : vector<2x128xf32> to vector<2x32xf32>
    %133 = arith.mulf %130, %116 : vector<2x32xf32>
    %134 = arith.mulf %129, %131 : vector<2x32xf32>
    %135 = arith.addf %133, %134 : vector<2x32xf32>
    %136 = math.tanh %135 : vector<2x32xf32>
    %137 = arith.mulf %132, %136 : vector<2x32xf32>
    %c12 = arith.constant 12 : index
    %c0_28 = arith.constant 0 : index
    %138 = vector.load %arg13[%c12, %c0_28] : memref<16x32xf32, #tpu.memory_space<vmem>>, vector<2x32xf32>
    tpu.vector_store %arg13[%c12, %c0_28], %137 {strides = array<i32>} : memref<16x32xf32, #tpu.memory_space<vmem>>, vector<2x32xf32>,
    %139 = vector.extract_strided_slice %6 {offsets = [14, 0], sizes = [2, 128], strides = [1, 1]} : vector<16x128xf32> to vector<2x128xf32>
    %cst_29 = arith.constant dense<0.000000e+00> : vector<2x128xf32>
    %140 = tpu.matmul %137, %2, %cst_29 {dimension_numbers = #tpu.dot_dimension_numbers<[1], [0], [0], [1], [0, 0, 1, 1], [], []>} : vector<2x32xf32>, vector<32x128xf32>, vector<2x128xf32> -> vector<2x128xf32>
    %141 = arith.addf %139, %140 : vector<2x128xf32>
    %142 = arith.negf %141 : vector<2x128xf32>
    %143 = math.exp %142 : vector<2x128xf32>
    %cst_30 = arith.constant 1.000000e+00 : f32
    %144 = vector.broadcast %cst_30 : f32 to vector<2x128xf32>
    %145 = arith.addf %144, %143 : vector<2x128xf32>
    %146 = arith.divf %144, %145 : vector<2x128xf32>
    %147 = math.tanh %141 : vector<2x128xf32>
    %148 = vector.extract_strided_slice %146 {offsets = [0, 0], sizes = [2, 32], strides = [1, 1]} : vector<2x128xf32> to vector<2x32xf32>
    %149 = vector.extract_strided_slice %146 {offsets = [0, 32], sizes = [2, 32], strides = [1, 1]} : vector<2x128xf32> to vector<2x32xf32>
    %150 = vector.extract_strided_slice %147 {offsets = [0, 64], sizes = [2, 32], strides = [1, 1]} : vector<2x128xf32> to vector<2x32xf32>
    %151 = vector.extract_strided_slice %146 {offsets = [0, 96], sizes = [2, 32], strides = [1, 1]} : vector<2x128xf32> to vector<2x32xf32>
    %152 = arith.mulf %149, %135 : vector<2x32xf32>
    %153 = arith.mulf %148, %150 : vector<2x32xf32>
    %154 = arith.addf %152, %153 : vector<2x32xf32>
    %155 = math.tanh %154 : vector<2x32xf32>
    %156 = arith.mulf %151, %155 : vector<2x32xf32>
    %c14 = arith.constant 14 : index
    %c0_31 = arith.constant 0 : index
    %157 = vector.load %arg13[%c14, %c0_31] : memref<16x32xf32, #tpu.memory_space<vmem>>, vector<2x32xf32>
    tpu.vector_store %arg13[%c14, %c0_31], %156 {strides = array<i32>} : memref<16x32xf32, #tpu.memory_space<vmem>>, vector<2x32xf32>,
    %c0_32 = arith.constant 0 : index
    %c0_33 = arith.constant 0 : index
    %158 = vector.load %arg13[%c0_32, %c0_33] : memref<16x32xf32, #tpu.memory_space<vmem>>, vector<16x32xf32>
    %c0_34 = arith.constant 0 : index
    %c0_35 = arith.constant 0 : index
    %159 = vector.load %arg4[%c0_34, %c0_35] : memref<32x128xf32, #tpu.memory_space<vmem>>, vector<32x128xf32>
    %c0_36 = arith.constant 0 : index
    %c0_37 = arith.constant 0 : index
    %160 = vector.load %arg5[%c0_36, %c0_37] : memref<32x128xf32, #tpu.memory_space<vmem>>, vector<32x128xf32>
    %c0_38 = arith.constant 0 : index
    %c0_39 = arith.constant 0 : index
    %161 = vector.load %arg6[%c0_38, %c0_39] : memref<1x128xf32, #tpu.memory_space<vmem>>, vector<1x128xf32>
    %cst_40 = arith.constant dense<0.000000e+00> : vector<16x128xf32>
    %162 = tpu.matmul %158, %159, %cst_40 {dimension_numbers = #tpu.dot_dimension_numbers<[1], [0], [0], [1], [0, 0, 1, 1], [], []>} : vector<16x32xf32>, vector<32x128xf32>, vector<16x128xf32> -> vector<16x128xf32>
    %163 = vector.broadcast %161 : vector<1x128xf32> to vector<16x128xf32>
    %164 = arith.addf %162, %163 : vector<16x128xf32>
    %cst_41 = arith.constant 0.000000e+00 : f32
    %165 = vector.broadcast %cst_41 : f32 to vector<2x32xf32>
    %166 = vector.extract_strided_slice %164 {offsets = [0, 0], sizes = [2, 128], strides = [1, 1]} : vector<16x128xf32> to vector<2x128xf32>
    %167 = arith.negf %166 : vector<2x128xf32>
    %168 = math.exp %167 : vector<2x128xf32>
    %cst_42 = arith.constant 1.000000e+00 : f32
    %169 = vector.broadcast %cst_42 : f32 to vector<2x128xf32>
    %170 = arith.addf %169, %168 : vector<2x128xf32>
    %171 = arith.divf %169, %170 : vector<2x128xf32>
    %172 = math.tanh %166 : vector<2x128xf32>
    %173 = vector.extract_strided_slice %171 {offsets = [0, 0], sizes = [2, 32], strides = [1, 1]} : vector<2x128xf32> to vector<2x32xf32>
    %174 = vector.extract_strided_slice %171 {offsets = [0, 32], sizes = [2, 32], strides = [1, 1]} : vector<2x128xf32> to vector<2x32xf32>
    %175 = vector.extract_strided_slice %172 {offsets = [0, 64], sizes = [2, 32], strides = [1, 1]} : vector<2x128xf32> to vector<2x32xf32>
    %176 = vector.extract_strided_slice %171 {offsets = [0, 96], sizes = [2, 32], strides = [1, 1]} : vector<2x128xf32> to vector<2x32xf32>
    %177 = arith.mulf %174, %165 : vector<2x32xf32>
    %178 = arith.mulf %173, %175 : vector<2x32xf32>
    %179 = arith.addf %177, %178 : vector<2x32xf32>
    %180 = math.tanh %179 : vector<2x32xf32>
    %181 = arith.mulf %176, %180 : vector<2x32xf32>
    %c0_43 = arith.constant 0 : index
    %c0_44 = arith.constant 0 : index
    %182 = vector.load %arg13[%c0_43, %c0_44] : memref<16x32xf32, #tpu.memory_space<vmem>>, vector<2x32xf32>
    tpu.vector_store %arg13[%c0_43, %c0_44], %181 {strides = array<i32>} : memref<16x32xf32, #tpu.memory_space<vmem>>, vector<2x32xf32>,
    %183 = vector.extract_strided_slice %164 {offsets = [2, 0], sizes = [2, 128], strides = [1, 1]} : vector<16x128xf32> to vector<2x128xf32>
    %cst_45 = arith.constant dense<0.000000e+00> : vector<2x128xf32>
    %184 = tpu.matmul %181, %160, %cst_45 {dimension_numbers = #tpu.dot_dimension_numbers<[1], [0], [0], [1], [0, 0, 1, 1], [], []>} : vector<2x32xf32>, vector<32x128xf32>, vector<2x128xf32> -> vector<2x128xf32>
    %185 = arith.addf %183, %184 : vector<2x128xf32>
    %186 = arith.negf %185 : vector<2x128xf32>
    %187 = math.exp %186 : vector<2x128xf32>
    %cst_46 = arith.constant 1.000000e+00 : f32
    %188 = vector.broadcast %cst_46 : f32 to vector<2x128xf32>
    %189 = arith.addf %188, %187 : vector<2x128xf32>
    %190 = arith.divf %188, %189 : vector<2x128xf32>
    %191 = math.tanh %185 : vector<2x128xf32>
    %192 = vector.extract_strided_slice %190 {offsets = [0, 0], sizes = [2, 32], strides = [1, 1]} : vector<2x128xf32> to vector<2x32xf32>
    %193 = vector.extract_strided_slice %190 {offsets = [0, 32], sizes = [2, 32], strides = [1, 1]} : vector<2x128xf32> to vector<2x32xf32>
    %194 = vector.extract_strided_slice %191 {offsets = [0, 64], sizes = [2, 32], strides = [1, 1]} : vector<2x128xf32> to vector<2x32xf32>
    %195 = vector.extract_strided_slice %190 {offsets = [0, 96], sizes = [2, 32], strides = [1, 1]} : vector<2x128xf32> to vector<2x32xf32>
    %196 = arith.mulf %193, %179 : vector<2x32xf32>
    %197 = arith.mulf %192, %194 : vector<2x32xf32>
    %198 = arith.addf %196, %197 : vector<2x32xf32>
    %199 = math.tanh %198 : vector<2x32xf32>
    %200 = arith.mulf %195, %199 : vector<2x32xf32>
    %c2_47 = arith.constant 2 : index
    %c0_48 = arith.constant 0 : index
    %201 = vector.load %arg13[%c2_47, %c0_48] : memref<16x32xf32, #tpu.memory_space<vmem>>, vector<2x32xf32>
    tpu.vector_store %arg13[%c2_47, %c0_48], %200 {strides = array<i32>} : memref<16x32xf32, #tpu.memory_space<vmem>>, vector<2x32xf32>,
    %202 = vector.extract_strided_slice %164 {offsets = [4, 0], sizes = [2, 128], strides = [1, 1]} : vector<16x128xf32> to vector<2x128xf32>
    %cst_49 = arith.constant dense<0.000000e+00> : vector<2x128xf32>
    %203 = tpu.matmul %200, %160, %cst_49 {dimension_numbers = #tpu.dot_dimension_numbers<[1], [0], [0], [1], [0, 0, 1, 1], [], []>} : vector<2x32xf32>, vector<32x128xf32>, vector<2x128xf32> -> vector<2x128xf32>
    %204 = arith.addf %202, %203 : vector<2x128xf32>
    %205 = arith.negf %204 : vector<2x128xf32>
    %206 = math.exp %205 : vector<2x128xf32>
    %cst_50 = arith.constant 1.000000e+00 : f32
    %207 = vector.broadcast %cst_50 : f32 to vector<2x128xf32>
    %208 = arith.addf %207, %206 : vector<2x128xf32>
    %209 = arith.divf %207, %208 : vector<2x128xf32>
    %210 = math.tanh %204 : vector<2x128xf32>
    %211 = vector.extract_strided_slice %209 {offsets = [0, 0], sizes = [2, 32], strides = [1, 1]} : vector<2x128xf32> to vector<2x32xf32>
    %212 = vector.extract_strided_slice %209 {offsets = [0, 32], sizes = [2, 32], strides = [1, 1]} : vector<2x128xf32> to vector<2x32xf32>
    %213 = vector.extract_strided_slice %210 {offsets = [0, 64], sizes = [2, 32], strides = [1, 1]} : vector<2x128xf32> to vector<2x32xf32>
    %214 = vector.extract_strided_slice %209 {offsets = [0, 96], sizes = [2, 32], strides = [1, 1]} : vector<2x128xf32> to vector<2x32xf32>
    %215 = arith.mulf %212, %198 : vector<2x32xf32>
    %216 = arith.mulf %211, %213 : vector<2x32xf32>
    %217 = arith.addf %215, %216 : vector<2x32xf32>
    %218 = math.tanh %217 : vector<2x32xf32>
    %219 = arith.mulf %214, %218 : vector<2x32xf32>
    %c4_51 = arith.constant 4 : index
    %c0_52 = arith.constant 0 : index
    %220 = vector.load %arg13[%c4_51, %c0_52] : memref<16x32xf32, #tpu.memory_space<vmem>>, vector<2x32xf32>
    tpu.vector_store %arg13[%c4_51, %c0_52], %219 {strides = array<i32>} : memref<16x32xf32, #tpu.memory_space<vmem>>, vector<2x32xf32>,
    %221 = vector.extract_strided_slice %164 {offsets = [6, 0], sizes = [2, 128], strides = [1, 1]} : vector<16x128xf32> to vector<2x128xf32>
    %cst_53 = arith.constant dense<0.000000e+00> : vector<2x128xf32>
    %222 = tpu.matmul %219, %160, %cst_53 {dimension_numbers = #tpu.dot_dimension_numbers<[1], [0], [0], [1], [0, 0, 1, 1], [], []>} : vector<2x32xf32>, vector<32x128xf32>, vector<2x128xf32> -> vector<2x128xf32>
    %223 = arith.addf %221, %222 : vector<2x128xf32>
    %224 = arith.negf %223 : vector<2x128xf32>
    %225 = math.exp %224 : vector<2x128xf32>
    %cst_54 = arith.constant 1.000000e+00 : f32
    %226 = vector.broadcast %cst_54 : f32 to vector<2x128xf32>
    %227 = arith.addf %226, %225 : vector<2x128xf32>
    %228 = arith.divf %226, %227 : vector<2x128xf32>
    %229 = math.tanh %223 : vector<2x128xf32>
    %230 = vector.extract_strided_slice %228 {offsets = [0, 0], sizes = [2, 32], strides = [1, 1]} : vector<2x128xf32> to vector<2x32xf32>
    %231 = vector.extract_strided_slice %228 {offsets = [0, 32], sizes = [2, 32], strides = [1, 1]} : vector<2x128xf32> to vector<2x32xf32>
    %232 = vector.extract_strided_slice %229 {offsets = [0, 64], sizes = [2, 32], strides = [1, 1]} : vector<2x128xf32> to vector<2x32xf32>
    %233 = vector.extract_strided_slice %228 {offsets = [0, 96], sizes = [2, 32], strides = [1, 1]} : vector<2x128xf32> to vector<2x32xf32>
    %234 = arith.mulf %231, %217 : vector<2x32xf32>
    %235 = arith.mulf %230, %232 : vector<2x32xf32>
    %236 = arith.addf %234, %235 : vector<2x32xf32>
    %237 = math.tanh %236 : vector<2x32xf32>
    %238 = arith.mulf %233, %237 : vector<2x32xf32>
    %c6_55 = arith.constant 6 : index
    %c0_56 = arith.constant 0 : index
    %239 = vector.load %arg13[%c6_55, %c0_56] : memref<16x32xf32, #tpu.memory_space<vmem>>, vector<2x32xf32>
    tpu.vector_store %arg13[%c6_55, %c0_56], %238 {strides = array<i32>} : memref<16x32xf32, #tpu.memory_space<vmem>>, vector<2x32xf32>,
    %240 = vector.extract_strided_slice %164 {offsets = [8, 0], sizes = [2, 128], strides = [1, 1]} : vector<16x128xf32> to vector<2x128xf32>
    %cst_57 = arith.constant dense<0.000000e+00> : vector<2x128xf32>
    %241 = tpu.matmul %238, %160, %cst_57 {dimension_numbers = #tpu.dot_dimension_numbers<[1], [0], [0], [1], [0, 0, 1, 1], [], []>} : vector<2x32xf32>, vector<32x128xf32>, vector<2x128xf32> -> vector<2x128xf32>
    %242 = arith.addf %240, %241 : vector<2x128xf32>
    %243 = arith.negf %242 : vector<2x128xf32>
    %244 = math.exp %243 : vector<2x128xf32>
    %cst_58 = arith.constant 1.000000e+00 : f32
    %245 = vector.broadcast %cst_58 : f32 to vector<2x128xf32>
    %246 = arith.addf %245, %244 : vector<2x128xf32>
    %247 = arith.divf %245, %246 : vector<2x128xf32>
    %248 = math.tanh %242 : vector<2x128xf32>
    %249 = vector.extract_strided_slice %247 {offsets = [0, 0], sizes = [2, 32], strides = [1, 1]} : vector<2x128xf32> to vector<2x32xf32>
    %250 = vector.extract_strided_slice %247 {offsets = [0, 32], sizes = [2, 32], strides = [1, 1]} : vector<2x128xf32> to vector<2x32xf32>
    %251 = vector.extract_strided_slice %248 {offsets = [0, 64], sizes = [2, 32], strides = [1, 1]} : vector<2x128xf32> to vector<2x32xf32>
    %252 = vector.extract_strided_slice %247 {offsets = [0, 96], sizes = [2, 32], strides = [1, 1]} : vector<2x128xf32> to vector<2x32xf32>
    %253 = arith.mulf %250, %236 : vector<2x32xf32>
    %254 = arith.mulf %249, %251 : vector<2x32xf32>
    %255 = arith.addf %253, %254 : vector<2x32xf32>
    %256 = math.tanh %255 : vector<2x32xf32>
    %257 = arith.mulf %252, %256 : vector<2x32xf32>
    %c8_59 = arith.constant 8 : index
    %c0_60 = arith.constant 0 : index
    %258 = vector.load %arg13[%c8_59, %c0_60] : memref<16x32xf32, #tpu.memory_space<vmem>>, vector<2x32xf32>
    tpu.vector_store %arg13[%c8_59, %c0_60], %257 {strides = array<i32>} : memref<16x32xf32, #tpu.memory_space<vmem>>, vector<2x32xf32>,
    %259 = vector.extract_strided_slice %164 {offsets = [10, 0], sizes = [2, 128], strides = [1, 1]} : vector<16x128xf32> to vector<2x128xf32>
    %cst_61 = arith.constant dense<0.000000e+00> : vector<2x128xf32>
    %260 = tpu.matmul %257, %160, %cst_61 {dimension_numbers = #tpu.dot_dimension_numbers<[1], [0], [0], [1], [0, 0, 1, 1], [], []>} : vector<2x32xf32>, vector<32x128xf32>, vector<2x128xf32> -> vector<2x128xf32>
    %261 = arith.addf %259, %260 : vector<2x128xf32>
    %262 = arith.negf %261 : vector<2x128xf32>
    %263 = math.exp %262 : vector<2x128xf32>
    %cst_62 = arith.constant 1.000000e+00 : f32
    %264 = vector.broadcast %cst_62 : f32 to vector<2x128xf32>
    %265 = arith.addf %264, %263 : vector<2x128xf32>
    %266 = arith.divf %264, %265 : vector<2x128xf32>
    %267 = math.tanh %261 : vector<2x128xf32>
    %268 = vector.extract_strided_slice %266 {offsets = [0, 0], sizes = [2, 32], strides = [1, 1]} : vector<2x128xf32> to vector<2x32xf32>
    %269 = vector.extract_strided_slice %266 {offsets = [0, 32], sizes = [2, 32], strides = [1, 1]} : vector<2x128xf32> to vector<2x32xf32>
    %270 = vector.extract_strided_slice %267 {offsets = [0, 64], sizes = [2, 32], strides = [1, 1]} : vector<2x128xf32> to vector<2x32xf32>
    %271 = vector.extract_strided_slice %266 {offsets = [0, 96], sizes = [2, 32], strides = [1, 1]} : vector<2x128xf32> to vector<2x32xf32>
    %272 = arith.mulf %269, %255 : vector<2x32xf32>
    %273 = arith.mulf %268, %270 : vector<2x32xf32>
    %274 = arith.addf %272, %273 : vector<2x32xf32>
    %275 = math.tanh %274 : vector<2x32xf32>
    %276 = arith.mulf %271, %275 : vector<2x32xf32>
    %c10_63 = arith.constant 10 : index
    %c0_64 = arith.constant 0 : index
    %277 = vector.load %arg13[%c10_63, %c0_64] : memref<16x32xf32, #tpu.memory_space<vmem>>, vector<2x32xf32>
    tpu.vector_store %arg13[%c10_63, %c0_64], %276 {strides = array<i32>} : memref<16x32xf32, #tpu.memory_space<vmem>>, vector<2x32xf32>,
    %278 = vector.extract_strided_slice %164 {offsets = [12, 0], sizes = [2, 128], strides = [1, 1]} : vector<16x128xf32> to vector<2x128xf32>
    %cst_65 = arith.constant dense<0.000000e+00> : vector<2x128xf32>
    %279 = tpu.matmul %276, %160, %cst_65 {dimension_numbers = #tpu.dot_dimension_numbers<[1], [0], [0], [1], [0, 0, 1, 1], [], []>} : vector<2x32xf32>, vector<32x128xf32>, vector<2x128xf32> -> vector<2x128xf32>
    %280 = arith.addf %278, %279 : vector<2x128xf32>
    %281 = arith.negf %280 : vector<2x128xf32>
    %282 = math.exp %281 : vector<2x128xf32>
    %cst_66 = arith.constant 1.000000e+00 : f32
    %283 = vector.broadcast %cst_66 : f32 to vector<2x128xf32>
    %284 = arith.addf %283, %282 : vector<2x128xf32>
    %285 = arith.divf %283, %284 : vector<2x128xf32>
    %286 = math.tanh %280 : vector<2x128xf32>
    %287 = vector.extract_strided_slice %285 {offsets = [0, 0], sizes = [2, 32], strides = [1, 1]} : vector<2x128xf32> to vector<2x32xf32>
    %288 = vector.extract_strided_slice %285 {offsets = [0, 32], sizes = [2, 32], strides = [1, 1]} : vector<2x128xf32> to vector<2x32xf32>
    %289 = vector.extract_strided_slice %286 {offsets = [0, 64], sizes = [2, 32], strides = [1, 1]} : vector<2x128xf32> to vector<2x32xf32>
    %290 = vector.extract_strided_slice %285 {offsets = [0, 96], sizes = [2, 32], strides = [1, 1]} : vector<2x128xf32> to vector<2x32xf32>
    %291 = arith.mulf %288, %274 : vector<2x32xf32>
    %292 = arith.mulf %287, %289 : vector<2x32xf32>
    %293 = arith.addf %291, %292 : vector<2x32xf32>
    %294 = math.tanh %293 : vector<2x32xf32>
    %295 = arith.mulf %290, %294 : vector<2x32xf32>
    %c12_67 = arith.constant 12 : index
    %c0_68 = arith.constant 0 : index
    %296 = vector.load %arg13[%c12_67, %c0_68] : memref<16x32xf32, #tpu.memory_space<vmem>>, vector<2x32xf32>
    tpu.vector_store %arg13[%c12_67, %c0_68], %295 {strides = array<i32>} : memref<16x32xf32, #tpu.memory_space<vmem>>, vector<2x32xf32>,
    %297 = vector.extract_strided_slice %164 {offsets = [14, 0], sizes = [2, 128], strides = [1, 1]} : vector<16x128xf32> to vector<2x128xf32>
    %cst_69 = arith.constant dense<0.000000e+00> : vector<2x128xf32>
    %298 = tpu.matmul %295, %160, %cst_69 {dimension_numbers = #tpu.dot_dimension_numbers<[1], [0], [0], [1], [0, 0, 1, 1], [], []>} : vector<2x32xf32>, vector<32x128xf32>, vector<2x128xf32> -> vector<2x128xf32>
    %299 = arith.addf %297, %298 : vector<2x128xf32>
    %300 = arith.negf %299 : vector<2x128xf32>
    %301 = math.exp %300 : vector<2x128xf32>
    %cst_70 = arith.constant 1.000000e+00 : f32
    %302 = vector.broadcast %cst_70 : f32 to vector<2x128xf32>
    %303 = arith.addf %302, %301 : vector<2x128xf32>
    %304 = arith.divf %302, %303 : vector<2x128xf32>
    %305 = math.tanh %299 : vector<2x128xf32>
    %306 = vector.extract_strided_slice %304 {offsets = [0, 0], sizes = [2, 32], strides = [1, 1]} : vector<2x128xf32> to vector<2x32xf32>
    %307 = vector.extract_strided_slice %304 {offsets = [0, 32], sizes = [2, 32], strides = [1, 1]} : vector<2x128xf32> to vector<2x32xf32>
    %308 = vector.extract_strided_slice %305 {offsets = [0, 64], sizes = [2, 32], strides = [1, 1]} : vector<2x128xf32> to vector<2x32xf32>
    %309 = vector.extract_strided_slice %304 {offsets = [0, 96], sizes = [2, 32], strides = [1, 1]} : vector<2x128xf32> to vector<2x32xf32>
    %310 = arith.mulf %307, %293 : vector<2x32xf32>
    %311 = arith.mulf %306, %308 : vector<2x32xf32>
    %312 = arith.addf %310, %311 : vector<2x32xf32>
    %313 = math.tanh %312 : vector<2x32xf32>
    %314 = arith.mulf %309, %313 : vector<2x32xf32>
    %c14_71 = arith.constant 14 : index
    %c0_72 = arith.constant 0 : index
    %315 = vector.load %arg13[%c14_71, %c0_72] : memref<16x32xf32, #tpu.memory_space<vmem>>, vector<2x32xf32>
    tpu.vector_store %arg13[%c14_71, %c0_72], %314 {strides = array<i32>} : memref<16x32xf32, #tpu.memory_space<vmem>>, vector<2x32xf32>,
    %c0_73 = arith.constant 0 : index
    %c0_74 = arith.constant 0 : index
    %316 = vector.load %arg13[%c0_73, %c0_74] : memref<16x32xf32, #tpu.memory_space<vmem>>, vector<16x32xf32>
    %c0_75 = arith.constant 0 : index
    %c0_76 = arith.constant 0 : index
    %317 = vector.load %arg7[%c0_75, %c0_76] : memref<32x128xf32, #tpu.memory_space<vmem>>, vector<32x128xf32>
    %c0_77 = arith.constant 0 : index
    %c0_78 = arith.constant 0 : index
    %318 = vector.load %arg8[%c0_77, %c0_78] : memref<32x128xf32, #tpu.memory_space<vmem>>, vector<32x128xf32>
    %c0_79 = arith.constant 0 : index
    %c0_80 = arith.constant 0 : index
    %319 = vector.load %arg9[%c0_79, %c0_80] : memref<1x128xf32, #tpu.memory_space<vmem>>, vector<1x128xf32>
    %cst_81 = arith.constant dense<0.000000e+00> : vector<16x128xf32>
    %320 = tpu.matmul %316, %317, %cst_81 {dimension_numbers = #tpu.dot_dimension_numbers<[1], [0], [0], [1], [0, 0, 1, 1], [], []>} : vector<16x32xf32>, vector<32x128xf32>, vector<16x128xf32> -> vector<16x128xf32>
    %321 = vector.broadcast %319 : vector<1x128xf32> to vector<16x128xf32>
    %322 = arith.addf %320, %321 : vector<16x128xf32>
    %cst_82 = arith.constant 0.000000e+00 : f32
    %323 = vector.broadcast %cst_82 : f32 to vector<2x32xf32>
    %324 = vector.extract_strided_slice %322 {offsets = [0, 0], sizes = [2, 128], strides = [1, 1]} : vector<16x128xf32> to vector<2x128xf32>
    %325 = arith.negf %324 : vector<2x128xf32>
    %326 = math.exp %325 : vector<2x128xf32>
    %cst_83 = arith.constant 1.000000e+00 : f32
    %327 = vector.broadcast %cst_83 : f32 to vector<2x128xf32>
    %328 = arith.addf %327, %326 : vector<2x128xf32>
    %329 = arith.divf %327, %328 : vector<2x128xf32>
    %330 = math.tanh %324 : vector<2x128xf32>
    %331 = vector.extract_strided_slice %329 {offsets = [0, 0], sizes = [2, 32], strides = [1, 1]} : vector<2x128xf32> to vector<2x32xf32>
    %332 = vector.extract_strided_slice %329 {offsets = [0, 32], sizes = [2, 32], strides = [1, 1]} : vector<2x128xf32> to vector<2x32xf32>
    %333 = vector.extract_strided_slice %330 {offsets = [0, 64], sizes = [2, 32], strides = [1, 1]} : vector<2x128xf32> to vector<2x32xf32>
    %334 = vector.extract_strided_slice %329 {offsets = [0, 96], sizes = [2, 32], strides = [1, 1]} : vector<2x128xf32> to vector<2x32xf32>
    %335 = arith.mulf %332, %323 : vector<2x32xf32>
    %336 = arith.mulf %331, %333 : vector<2x32xf32>
    %337 = arith.addf %335, %336 : vector<2x32xf32>
    %338 = math.tanh %337 : vector<2x32xf32>
    %339 = arith.mulf %334, %338 : vector<2x32xf32>
    %340 = vector.extract_strided_slice %322 {offsets = [2, 0], sizes = [2, 128], strides = [1, 1]} : vector<16x128xf32> to vector<2x128xf32>
    %cst_84 = arith.constant dense<0.000000e+00> : vector<2x128xf32>
    %341 = tpu.matmul %339, %318, %cst_84 {dimension_numbers = #tpu.dot_dimension_numbers<[1], [0], [0], [1], [0, 0, 1, 1], [], []>} : vector<2x32xf32>, vector<32x128xf32>, vector<2x128xf32> -> vector<2x128xf32>
    %342 = arith.addf %340, %341 : vector<2x128xf32>
    %343 = arith.negf %342 : vector<2x128xf32>
    %344 = math.exp %343 : vector<2x128xf32>
    %cst_85 = arith.constant 1.000000e+00 : f32
    %345 = vector.broadcast %cst_85 : f32 to vector<2x128xf32>
    %346 = arith.addf %345, %344 : vector<2x128xf32>
    %347 = arith.divf %345, %346 : vector<2x128xf32>
    %348 = math.tanh %342 : vector<2x128xf32>
    %349 = vector.extract_strided_slice %347 {offsets = [0, 0], sizes = [2, 32], strides = [1, 1]} : vector<2x128xf32> to vector<2x32xf32>
    %350 = vector.extract_strided_slice %347 {offsets = [0, 32], sizes = [2, 32], strides = [1, 1]} : vector<2x128xf32> to vector<2x32xf32>
    %351 = vector.extract_strided_slice %348 {offsets = [0, 64], sizes = [2, 32], strides = [1, 1]} : vector<2x128xf32> to vector<2x32xf32>
    %352 = vector.extract_strided_slice %347 {offsets = [0, 96], sizes = [2, 32], strides = [1, 1]} : vector<2x128xf32> to vector<2x32xf32>
    %353 = arith.mulf %350, %337 : vector<2x32xf32>
    %354 = arith.mulf %349, %351 : vector<2x32xf32>
    %355 = arith.addf %353, %354 : vector<2x32xf32>
    %356 = math.tanh %355 : vector<2x32xf32>
    %357 = arith.mulf %352, %356 : vector<2x32xf32>
    %358 = vector.extract_strided_slice %322 {offsets = [4, 0], sizes = [2, 128], strides = [1, 1]} : vector<16x128xf32> to vector<2x128xf32>
    %cst_86 = arith.constant dense<0.000000e+00> : vector<2x128xf32>
    %359 = tpu.matmul %357, %318, %cst_86 {dimension_numbers = #tpu.dot_dimension_numbers<[1], [0], [0], [1], [0, 0, 1, 1], [], []>} : vector<2x32xf32>, vector<32x128xf32>, vector<2x128xf32> -> vector<2x128xf32>
    %360 = arith.addf %358, %359 : vector<2x128xf32>
    %361 = arith.negf %360 : vector<2x128xf32>
    %362 = math.exp %361 : vector<2x128xf32>
    %cst_87 = arith.constant 1.000000e+00 : f32
    %363 = vector.broadcast %cst_87 : f32 to vector<2x128xf32>
    %364 = arith.addf %363, %362 : vector<2x128xf32>
    %365 = arith.divf %363, %364 : vector<2x128xf32>
    %366 = math.tanh %360 : vector<2x128xf32>
    %367 = vector.extract_strided_slice %365 {offsets = [0, 0], sizes = [2, 32], strides = [1, 1]} : vector<2x128xf32> to vector<2x32xf32>
    %368 = vector.extract_strided_slice %365 {offsets = [0, 32], sizes = [2, 32], strides = [1, 1]} : vector<2x128xf32> to vector<2x32xf32>
    %369 = vector.extract_strided_slice %366 {offsets = [0, 64], sizes = [2, 32], strides = [1, 1]} : vector<2x128xf32> to vector<2x32xf32>
    %370 = vector.extract_strided_slice %365 {offsets = [0, 96], sizes = [2, 32], strides = [1, 1]} : vector<2x128xf32> to vector<2x32xf32>
    %371 = arith.mulf %368, %355 : vector<2x32xf32>
    %372 = arith.mulf %367, %369 : vector<2x32xf32>
    %373 = arith.addf %371, %372 : vector<2x32xf32>
    %374 = math.tanh %373 : vector<2x32xf32>
    %375 = arith.mulf %370, %374 : vector<2x32xf32>
    %376 = vector.extract_strided_slice %322 {offsets = [6, 0], sizes = [2, 128], strides = [1, 1]} : vector<16x128xf32> to vector<2x128xf32>
    %cst_88 = arith.constant dense<0.000000e+00> : vector<2x128xf32>
    %377 = tpu.matmul %375, %318, %cst_88 {dimension_numbers = #tpu.dot_dimension_numbers<[1], [0], [0], [1], [0, 0, 1, 1], [], []>} : vector<2x32xf32>, vector<32x128xf32>, vector<2x128xf32> -> vector<2x128xf32>
    %378 = arith.addf %376, %377 : vector<2x128xf32>
    %379 = arith.negf %378 : vector<2x128xf32>
    %380 = math.exp %379 : vector<2x128xf32>
    %cst_89 = arith.constant 1.000000e+00 : f32
    %381 = vector.broadcast %cst_89 : f32 to vector<2x128xf32>
    %382 = arith.addf %381, %380 : vector<2x128xf32>
    %383 = arith.divf %381, %382 : vector<2x128xf32>
    %384 = math.tanh %378 : vector<2x128xf32>
    %385 = vector.extract_strided_slice %383 {offsets = [0, 0], sizes = [2, 32], strides = [1, 1]} : vector<2x128xf32> to vector<2x32xf32>
    %386 = vector.extract_strided_slice %383 {offsets = [0, 32], sizes = [2, 32], strides = [1, 1]} : vector<2x128xf32> to vector<2x32xf32>
    %387 = vector.extract_strided_slice %384 {offsets = [0, 64], sizes = [2, 32], strides = [1, 1]} : vector<2x128xf32> to vector<2x32xf32>
    %388 = vector.extract_strided_slice %383 {offsets = [0, 96], sizes = [2, 32], strides = [1, 1]} : vector<2x128xf32> to vector<2x32xf32>
    %389 = arith.mulf %386, %373 : vector<2x32xf32>
    %390 = arith.mulf %385, %387 : vector<2x32xf32>
    %391 = arith.addf %389, %390 : vector<2x32xf32>
    %392 = math.tanh %391 : vector<2x32xf32>
    %393 = arith.mulf %388, %392 : vector<2x32xf32>
    %394 = vector.extract_strided_slice %322 {offsets = [8, 0], sizes = [2, 128], strides = [1, 1]} : vector<16x128xf32> to vector<2x128xf32>
    %cst_90 = arith.constant dense<0.000000e+00> : vector<2x128xf32>
    %395 = tpu.matmul %393, %318, %cst_90 {dimension_numbers = #tpu.dot_dimension_numbers<[1], [0], [0], [1], [0, 0, 1, 1], [], []>} : vector<2x32xf32>, vector<32x128xf32>, vector<2x128xf32> -> vector<2x128xf32>
    %396 = arith.addf %394, %395 : vector<2x128xf32>
    %397 = arith.negf %396 : vector<2x128xf32>
    %398 = math.exp %397 : vector<2x128xf32>
    %cst_91 = arith.constant 1.000000e+00 : f32
    %399 = vector.broadcast %cst_91 : f32 to vector<2x128xf32>
    %400 = arith.addf %399, %398 : vector<2x128xf32>
    %401 = arith.divf %399, %400 : vector<2x128xf32>
    %402 = math.tanh %396 : vector<2x128xf32>
    %403 = vector.extract_strided_slice %401 {offsets = [0, 0], sizes = [2, 32], strides = [1, 1]} : vector<2x128xf32> to vector<2x32xf32>
    %404 = vector.extract_strided_slice %401 {offsets = [0, 32], sizes = [2, 32], strides = [1, 1]} : vector<2x128xf32> to vector<2x32xf32>
    %405 = vector.extract_strided_slice %402 {offsets = [0, 64], sizes = [2, 32], strides = [1, 1]} : vector<2x128xf32> to vector<2x32xf32>
    %406 = vector.extract_strided_slice %401 {offsets = [0, 96], sizes = [2, 32], strides = [1, 1]} : vector<2x128xf32> to vector<2x32xf32>
    %407 = arith.mulf %404, %391 : vector<2x32xf32>
    %408 = arith.mulf %403, %405 : vector<2x32xf32>
    %409 = arith.addf %407, %408 : vector<2x32xf32>
    %410 = math.tanh %409 : vector<2x32xf32>
    %411 = arith.mulf %406, %410 : vector<2x32xf32>
    %412 = vector.extract_strided_slice %322 {offsets = [10, 0], sizes = [2, 128], strides = [1, 1]} : vector<16x128xf32> to vector<2x128xf32>
    %cst_92 = arith.constant dense<0.000000e+00> : vector<2x128xf32>
    %413 = tpu.matmul %411, %318, %cst_92 {dimension_numbers = #tpu.dot_dimension_numbers<[1], [0], [0], [1], [0, 0, 1, 1], [], []>} : vector<2x32xf32>, vector<32x128xf32>, vector<2x128xf32> -> vector<2x128xf32>
    %414 = arith.addf %412, %413 : vector<2x128xf32>
    %415 = arith.negf %414 : vector<2x128xf32>
    %416 = math.exp %415 : vector<2x128xf32>
    %cst_93 = arith.constant 1.000000e+00 : f32
    %417 = vector.broadcast %cst_93 : f32 to vector<2x128xf32>
    %418 = arith.addf %417, %416 : vector<2x128xf32>
    %419 = arith.divf %417, %418 : vector<2x128xf32>
    %420 = math.tanh %414 : vector<2x128xf32>
    %421 = vector.extract_strided_slice %419 {offsets = [0, 0], sizes = [2, 32], strides = [1, 1]} : vector<2x128xf32> to vector<2x32xf32>
    %422 = vector.extract_strided_slice %419 {offsets = [0, 32], sizes = [2, 32], strides = [1, 1]} : vector<2x128xf32> to vector<2x32xf32>
    %423 = vector.extract_strided_slice %420 {offsets = [0, 64], sizes = [2, 32], strides = [1, 1]} : vector<2x128xf32> to vector<2x32xf32>
    %424 = vector.extract_strided_slice %419 {offsets = [0, 96], sizes = [2, 32], strides = [1, 1]} : vector<2x128xf32> to vector<2x32xf32>
    %425 = arith.mulf %422, %409 : vector<2x32xf32>
    %426 = arith.mulf %421, %423 : vector<2x32xf32>
    %427 = arith.addf %425, %426 : vector<2x32xf32>
    %428 = math.tanh %427 : vector<2x32xf32>
    %429 = arith.mulf %424, %428 : vector<2x32xf32>
    %430 = vector.extract_strided_slice %322 {offsets = [12, 0], sizes = [2, 128], strides = [1, 1]} : vector<16x128xf32> to vector<2x128xf32>
    %cst_94 = arith.constant dense<0.000000e+00> : vector<2x128xf32>
    %431 = tpu.matmul %429, %318, %cst_94 {dimension_numbers = #tpu.dot_dimension_numbers<[1], [0], [0], [1], [0, 0, 1, 1], [], []>} : vector<2x32xf32>, vector<32x128xf32>, vector<2x128xf32> -> vector<2x128xf32>
    %432 = arith.addf %430, %431 : vector<2x128xf32>
    %433 = arith.negf %432 : vector<2x128xf32>
    %434 = math.exp %433 : vector<2x128xf32>
    %cst_95 = arith.constant 1.000000e+00 : f32
    %435 = vector.broadcast %cst_95 : f32 to vector<2x128xf32>
    %436 = arith.addf %435, %434 : vector<2x128xf32>
    %437 = arith.divf %435, %436 : vector<2x128xf32>
    %438 = math.tanh %432 : vector<2x128xf32>
    %439 = vector.extract_strided_slice %437 {offsets = [0, 0], sizes = [2, 32], strides = [1, 1]} : vector<2x128xf32> to vector<2x32xf32>
    %440 = vector.extract_strided_slice %437 {offsets = [0, 32], sizes = [2, 32], strides = [1, 1]} : vector<2x128xf32> to vector<2x32xf32>
    %441 = vector.extract_strided_slice %438 {offsets = [0, 64], sizes = [2, 32], strides = [1, 1]} : vector<2x128xf32> to vector<2x32xf32>
    %442 = vector.extract_strided_slice %437 {offsets = [0, 96], sizes = [2, 32], strides = [1, 1]} : vector<2x128xf32> to vector<2x32xf32>
    %443 = arith.mulf %440, %427 : vector<2x32xf32>
    %444 = arith.mulf %439, %441 : vector<2x32xf32>
    %445 = arith.addf %443, %444 : vector<2x32xf32>
    %446 = math.tanh %445 : vector<2x32xf32>
    %447 = arith.mulf %442, %446 : vector<2x32xf32>
    %448 = vector.extract_strided_slice %322 {offsets = [14, 0], sizes = [2, 128], strides = [1, 1]} : vector<16x128xf32> to vector<2x128xf32>
    %cst_96 = arith.constant dense<0.000000e+00> : vector<2x128xf32>
    %449 = tpu.matmul %447, %318, %cst_96 {dimension_numbers = #tpu.dot_dimension_numbers<[1], [0], [0], [1], [0, 0, 1, 1], [], []>} : vector<2x32xf32>, vector<32x128xf32>, vector<2x128xf32> -> vector<2x128xf32>
    %450 = arith.addf %448, %449 : vector<2x128xf32>
    %451 = arith.negf %450 : vector<2x128xf32>
    %452 = math.exp %451 : vector<2x128xf32>
    %cst_97 = arith.constant 1.000000e+00 : f32
    %453 = vector.broadcast %cst_97 : f32 to vector<2x128xf32>
    %454 = arith.addf %453, %452 : vector<2x128xf32>
    %455 = arith.divf %453, %454 : vector<2x128xf32>
    %456 = math.tanh %450 : vector<2x128xf32>
    %457 = vector.extract_strided_slice %455 {offsets = [0, 0], sizes = [2, 32], strides = [1, 1]} : vector<2x128xf32> to vector<2x32xf32>
    %458 = vector.extract_strided_slice %455 {offsets = [0, 32], sizes = [2, 32], strides = [1, 1]} : vector<2x128xf32> to vector<2x32xf32>
    %459 = vector.extract_strided_slice %456 {offsets = [0, 64], sizes = [2, 32], strides = [1, 1]} : vector<2x128xf32> to vector<2x32xf32>
    %460 = vector.extract_strided_slice %455 {offsets = [0, 96], sizes = [2, 32], strides = [1, 1]} : vector<2x128xf32> to vector<2x32xf32>
    %461 = arith.mulf %458, %445 : vector<2x32xf32>
    %462 = arith.mulf %457, %459 : vector<2x32xf32>
    %463 = arith.addf %461, %462 : vector<2x32xf32>
    %464 = math.tanh %463 : vector<2x32xf32>
    %465 = arith.mulf %460, %464 : vector<2x32xf32>
    %c0_98 = arith.constant 0 : index
    %c0_99 = arith.constant 0 : index
    %466 = vector.load %arg10[%c0_98, %c0_99] : memref<32x1xf32, #tpu.memory_space<vmem>>, vector<32x1xf32>
    %cst_100 = arith.constant dense<0.000000e+00> : vector<2x1xf32>
    %467 = tpu.matmul %465, %466, %cst_100 {dimension_numbers = #tpu.dot_dimension_numbers<[1], [0], [0], [1], [0, 0, 1, 1], [], []>} : vector<2x32xf32>, vector<32x1xf32>, vector<2x1xf32> -> vector<2x1xf32>
    %c0_101 = arith.constant 0 : index
    %c0_102 = arith.constant 0 : index
    %468 = vector.load %arg11[%c0_101, %c0_102] : memref<1x1xf32, #tpu.memory_space<vmem>>, vector<1x1xf32>
    %469 = vector.broadcast %468 : vector<1x1xf32> to vector<2x1xf32>
    %470 = arith.addf %467, %469 : vector<2x1xf32>
    %c0_103 = arith.constant 0 : index
    %c0_104 = arith.constant 0 : index
    %471 = vector.load %arg12[%c0_103, %c0_104] : memref<2x1xf32, #tpu.memory_space<vmem>>, vector<2x1xf32>
    tpu.vector_store %arg12[%c0_103, %c0_104], %470 {strides = array<i32>} : memref<2x1xf32, #tpu.memory_space<vmem>>, vector<2x1xf32>,
    return
  }
}

</mosaic_0001>

<bundles_post_ra>
// kernel: tpu_custom_call.1
= control target key start
LH: loop header
LB: loop body
LE: loop exit
PB: predicated region body
PF: predicated region fallthrough
CT: control target
= control target key end

     0   :  { %s4396_s0 = inlined_call_operand.hbm [shape: f32[16,48], index: 0, kind: input, shape index: {}]   ;;  %s4397_s1 = inlined_call_operand.hbm [shape: f32[48,128], index: 1, kind: input, shape index: {}]   ;;  %s4398_s2 = inlined_call_operand.vmem [shape: f32[32,128], index: 2, kind: input, shape index: {}]   ;;  %s4399_s3 = inlined_call_operand.vmem [shape: f32[1,128], index: 3, kind: input, shape index: {}]   ;;  %s4400_s4 = inlined_call_operand.hbm [shape: f32[32,128], index: 4, kind: input, shape index: {}]   ;;  %s4401_s5 = inlined_call_operand.hbm [shape: f32[32,128], index: 5, kind: input, shape index: {}]   ;;  %s4402_s6 = inlined_call_operand.vmem [shape: f32[1,128], index: 6, kind: input, shape index: {}]   ;;  %s4403_s7 = inlined_call_operand.hbm [shape: f32[32,128], index: 7, kind: input, shape index: {}]   ;;  %s4404_s8 = inlined_call_operand.vmem [shape: f32[32,128], index: 8, kind: input, shape index: {}]   ;;  %s4405_s9 = inlined_call_operand.vmem [shape: f32[1,128], index: 9, kind: input, shape index: {}]   ;;  %s4406_s10 = inlined_call_operand.vmem [shape: f32[32,1], index: 10, kind: input, shape index: {}]   ;;  %s4407_s11 = inlined_call_operand.<no memory space> [shape: f32[1,1], index: 11, kind: input, shape index: {}]   ;;  %s4408_s12 = inlined_call_operand.vmem [shape: f32[2,1], index: 12, kind: output, shape index: {}]  }
   0x1   :  { %v17_v0 = vstv %s4407_s11 }
   0x2   :  { %18 = vst [vmem:[#allocation3] sm:$0x1] %v17_v0 }
   0x3   :  { %19 = vsyncpa [#allocation5], 0 }
   0x4   :  { %20 = vsyncpa [#allocation7], 0 }
   0x5   :  { %21 = vsyncpa [#allocation10], 0  ;;  %s3816_s23 = smov [#allocation6]   ;;  %s3817_s25 = smov [#allocation9]  }
   0x6   :  { %s39_s24 = sshll.u32 %s3816_s23, 4  ;;  %s67_s26 = sshll.u32 %s3817_s25, 4  ;;  %s40_s24 = int_to_ptr.vmem [resolvable:$true] %s39_s24  ;;  %s3896_s26 = int_to_ptr.vmem [resolvable:$true] %s67_s26 }
   0x7   :  { %s3700_s29 = scalar_lea.hbm %s4397_s1, 768 }
   0x8   :  { %p3701_p0 = scmp.ne.s32.totalorder %s4397_s1, %s3700_s29  ;;  %p3704_p1 = scmp.lt.u32.totalorder %s3700_s29, %s4397_s1 }
   0xa   :  { %p3706_p2 = pnand %p3704_p1, %p3701_p0 }
   0xc   :  { %3709 = shalt.err (!%p3706_p2)
}
   0xd   :  { %s3710_s15 = scalar_lea.vmem %s40_s24, 768  ;;  %p3715_p4 = scmp.lt.s32.totalorder %s40_s24, %s40_s24 }
   0xe   :  { %p3711_p3 = scmp.ne.s32.totalorder %s40_s24, %s3710_s15  ;;  %p3716_p5 = scmp.lt.s32.totalorder %s3710_s15, %s3710_s15 }
  0x10   :  { %p3717_p6 = por %p3716_p5, %p3715_p4 }
  0x12   :  { %p3718_p7 = pnand %p3717_p6, %p3711_p3 }
  0x14   :  { %3721 = shalt.err (!%p3718_p7)
}
  0x15   :  { %s3818_s16 = smov 128   ;;  %s3819_s17 = smov 8  }
  0x16   :  { %45 = dma.hbm_to_vmem [thread:$0]  %s4397_s1, 768, %s40_s24, [#allocation7], %s3818_s16, %s3818_s16, %s3819_s17  }
  0x17   :  { %s3722_s22 = scalar_lea.hbm %s4401_s5, 512 }
  0x18   :  { %p3723_p8 = scmp.ne.s32.totalorder %s4401_s5, %s3722_s22  ;;  %p3726_p9 = scmp.lt.u32.totalorder %s3722_s22, %s4401_s5 }
  0x1a   :  { %p3728_p10 = pnand %p3726_p9, %p3723_p8 }
  0x1c   :  { %3731 = shalt.err (!%p3728_p10)
}
  0x1d   :  { %s3732_s29 = scalar_lea.vmem %s3896_s26, 512  ;;  %p3737_p12 = scmp.lt.s32.totalorder %s3896_s26, %s3896_s26 }
  0x1e   :  { %p3733_p11 = scmp.ne.s32.totalorder %s3896_s26, %s3732_s29  ;;  %p3738_p13 = scmp.lt.s32.totalorder %s3732_s29, %s3732_s29 }
  0x20   :  { %p3739_p0 = por %p3738_p13, %p3737_p12 }
  0x22   :  { %p3740_p1 = pnand %p3739_p0, %p3733_p11 }
  0x24   :  { %3743 = shalt.err (!%p3740_p1)
}
  0x25   :  { %73 = dma.hbm_to_vmem [thread:$0]  %s4401_s5, 512, %s3896_s26, [#allocation10], %s3818_s16, %s3818_s16, %s3819_s17  }
  0x26   :  { %s3820_s30 = smov [#allocation4]   ;;  %s3821_s11 = smov [#allocation8]  }
  0x27   :  { %s27_s13 = sshll.u32 %s3820_s30, 4  ;;  %s55_s14 = sshll.u32 %s3821_s11, 4  ;;  %s28_s13 = int_to_ptr.vmem [resolvable:$true] %s27_s13  ;;  %s3933_s14 = int_to_ptr.vmem [resolvable:$true] %s55_s14 }
  0x28   :  { %s3744_s19 = scalar_lea.hbm %s4396_s0, 256 }
  0x29   :  { %p3745_p2 = scmp.ne.s32.totalorder %s4396_s0, %s3744_s19  ;;  %p3748_p3 = scmp.lt.u32.totalorder %s3744_s19, %s4396_s0 }
  0x2b   :  { %p3750_p4 = pnand %p3748_p3, %p3745_p2 }
  0x2d   :  { %3753 = shalt.err (!%p3750_p4)
}
  0x2e   :  { %s3754_s5 = scalar_lea.vmem %s28_s13, 256  ;;  %p3759_p6 = scmp.lt.s32.totalorder %s28_s13, %s28_s13 }
  0x2f   :  { %p3755_p5 = scmp.ne.s32.totalorder %s28_s13, %s3754_s5  ;;  %p3760_p7 = scmp.lt.s32.totalorder %s3754_s5, %s3754_s5 }
  0x31   :  { %p3761_p8 = por %p3760_p7, %p3759_p6 }
  0x33   :  { %p3762_p9 = pnand %p3761_p8, %p3755_p5 }
  0x35   :  { %3765 = shalt.err (!%p3762_p9)
}
  0x36   :  { %33 = dma.hbm_to_vmem [thread:$0]  %s4396_s0, 256, %s28_s13, [#allocation5], %s3818_s16, %s3818_s16, %s3819_s17  }
  0x37   :  { %s3766_s29 = scalar_lea.hbm %s4400_s4, 512 }
  0x38   :  { %p3767_p10 = scmp.ne.s32.totalorder %s4400_s4, %s3766_s29  ;;  %p3770_p11 = scmp.lt.u32.totalorder %s3766_s29, %s4400_s4 }
  0x3a   :  { %p3772_p12 = pnand %p3770_p11, %p3767_p10 }
  0x3c   :  { %3775 = shalt.err (!%p3772_p12)
}
  0x3d   :  { %s3776_s15 = scalar_lea.vmem %s3933_s14, 512  ;;  %p3781_p0 = scmp.lt.s32.totalorder %s3933_s14, %s3933_s14 }
  0x3e   :  { %p3777_p13 = scmp.ne.s32.totalorder %s3933_s14, %s3776_s15  ;;  %p3782_p1 = scmp.lt.s32.totalorder %s3776_s15, %s3776_s15 }
  0x40   :  { %p3783_p2 = por %p3782_p1, %p3781_p0 }
  0x42   :  { %p3784_p3 = pnand %p3783_p2, %p3777_p13 }
  0x44   :  { %3787 = shalt.err (!%p3784_p3)
}
  0x45   :  { %61 = dma.hbm_to_vmem [thread:$0]  %s4400_s4, 512, %s3933_s14, [#allocation7], %s3818_s16, %s3818_s16, %s3819_s17  }
  0x46   :  { %s3822_s18 = smov [#allocation11]   ;;  %s3788_s22 = scalar_lea.hbm %s4403_s7, 512 }
  0x47   :  { %s81_s19 = sshll.u32 %s3822_s18, 4  ;;  %p3789_p4 = scmp.ne.s32.totalorder %s4403_s7, %s3788_s22  ;;  %s82_s19 = int_to_ptr.vmem [resolvable:$true] %s81_s19 }
  0x48   :  { %p3792_p5 = scmp.lt.u32.totalorder %s3788_s22, %s4403_s7 }
  0x4a   :  { %p3794_p6 = pnand %p3792_p5, %p3789_p4 }
  0x4c   :  { %3797 = shalt.err (!%p3794_p6)
}
  0x4d   :  { %s3798_s27 = scalar_lea.vmem %s82_s19, 512  ;;  %p3803_p8 = scmp.lt.s32.totalorder %s82_s19, %s82_s19 }
  0x4e   :  { %p3799_p7 = scmp.ne.s32.totalorder %s82_s19, %s3798_s27  ;;  %p3804_p9 = scmp.lt.s32.totalorder %s3798_s27, %s3798_s27 }
  0x50   :  { %p3805_p10 = por %p3804_p9, %p3803_p8 }
  0x52   :  { %p3806_p11 = pnand %p3805_p10, %p3799_p7 }
  0x54   :  { %3809 = shalt.err (!%p3806_p11)
}
  0x55   :  { %87 = dma.hbm_to_vmem [thread:$0]  %s4403_s7, 512, %s82_s19, [#allocation10], %s3818_s16, %s3818_s16, %s3819_s17  }
  0x56   :  { %3810 = dma.done.wait [#allocation5], 256  }
  0x57   :  { %3811 = vsyncadd [#allocation5], 4294967040 }
  0x58   :  { %3812 = dma.done.wait [#allocation7], 1280  }
  0x59   :  { %3813 = vsyncadd [#allocation7], 4294966016 }
  0x5a   :  { %3814 = dma.done.wait [#allocation10], 1024  }
  0x5b   :  { %3815 = vsyncadd [#allocation10], 4294966272  ;;  %v113_v1 = vld [vmem:[#allocation6] sm:$0xff]  ;;  %v114_v2 = vld [vmem:[#allocation6 + $0x8] sm:$0xff]  ;;  %vm130_vm0 = vcmask 392192   ;;  %s3823_s17 = smov 64  }
  0x5c   :  { %v115_v3 = vld [vmem:[#allocation6 + $0x10] sm:$0xff]  ;;  %v3336_v4 = vpack.c.bf16 %v114_v2, %v113_v1  ;;  %v116_v5 = vld [vmem:[#allocation6 + $0x18] sm:$0xff]  ;;  %v117_v7 = vld [vmem:[#allocation6 + $0x20] sm:$0xff]  ;;  %v3825_v30 = vmov 0.0|0.0   ;;  %vm3826_vm1 = vmmov 0   ;;  %v3827_v33 = vmov 0.0  }
  0x5d   :  { %v3340_v6 = vpack.c.bf16 %v116_v5, %v115_v3  ;;  %v118_v8 = vld [vmem:[#allocation6 + $0x28] sm:$0xff]  ;;  %v111_v9 = vld [vmem:[#allocation4] sm:$0xff]  ;;  %v112_v11 = vld [vmem:[#allocation4 + $0x8] sm:$0xff]  ;;  %3348 = vmatprep.subr.bf16.mxu1 %v3825_v30  ;;  %3080 = vmatprep.mubr.msk.f32.mxu1 %vm3826_vm1, %v3827_v33  ;;  %vm240_vm2 = vcmask 254976   ;;  %vm242_vm3 = vcmask 261120   ;;  %vm350_vm4 = vcmask 257026  }
  0x5e   :  { %3337 = vmatprep.subr.bf16.mxu0 %v3336_v4  ;;  %3069 = vmatprep.mubr.msk.f32.mxu0 %vm130_vm0, %v111_v9  ;;  %v3344_v10 = vpack.c.bf16 %v118_v8, %v117_v7  ;;  %v2871_v12 = vld [vmem:[%s4399_s3] ss:$0 sm:$0xff]  ;;  %s3824_s3 = smov 32   ;;  %v120_v28 = vld [vmem:[%s4398_s2 + $0x8] sm:$0xff]  ;;  %v121_v29 = vld [vmem:[%s4398_s2 + $0x10] sm:$0xff]  ;;  %vm574_vm5 = vcmask 261126  }
  0x5f   :  { %3339 = vmatpush3.bf16.msra.mxu0 %v3336_v4  ;;  %v119_v27 = vld [vmem:[%s4398_s2] sm:$0xff]  ;;  %v122_v32 = vld [vmem:[%s4398_s2 + $0x18] sm:$0xff]  ;;  %vm462_vm6 = vcmask 259076   ;;  %vm2862_vm7 = vcmask 1024  }
  0x60   :  { %3341 = vmatprep.subr.bf16.mxu0 %v3340_v6  ;;  %v4008_v31 = vpack.c.bf16 %v120_v28, %v119_v27  ;;  %v4019_v34 = vpack.c.bf16 %v122_v32, %v121_v29 }
  0x62   :  { %3350 = vmatpush3.bf16.msra.mxu1 %v4008_v31 }
  0x63   :  { %3343 = vmatpush3.bf16.msra.mxu0 %v3340_v6  ;;  %3351 = vmatprep.subr.bf16.mxu1 %v3825_v30 }
  0x64   :  { %3345 = vmatprep.subr.bf16.mxu0 %v3344_v10 }
  0x66   :  { %3353 = vmatpush3.bf16.msra.mxu1 %v4019_v34 }
  0x67   :  { %3347 = vmatpush3.bf16.msra.mxu0 %v3344_v10  ;;  %3354 = vmatprep.subr.bf16.mxu1 %v3825_v30 }
  0x68   :  { %3360 = vmatprep.subr.bf16.mxu0 %v3825_v30 }
  0x6a   :  { %3070 = vmatmul.mubr.msk.f32.vlgmr.msra.gmra.mrb[0].mxu0 %vm130_vm0, %v112_v11 }
  0x6b   :  { %3102 = vmatprep.mubr.msk.f32.mxu0 %vm3826_vm1, %v3827_v33  ;;  %3362 = vmatpush3.bf16.msra.mxu0 %v4008_v31 }
  0x6c   :  { %3363 = vmatprep.subr.bf16.mxu0 %v3825_v30 }
  0x6f   :  { %3365 = vmatpush3.bf16.msra.mxu0 %v4019_v34 }
  0x70   :  { %3372 = vmatprep.subr.bf16.mxu0 %v3825_v30 }
 0x13d   :  { %v3071_v13 = vpop.f32.mrb[0].mxu0 }
 0x13e   :  { %v3990_v14 = vadd.f32 %v3071_v13, %v2871_v12  ;;  %v203_v15 = vpop.f32.mrb[1].mxu0 }
 0x13f   :  { %v3992_v16 = vadd.f32 %v2871_v12, %v203_v15 }
 0x141   :  { %3508 = vtanh.f32 %v3992_v16  ;;  %v2874_v18 = vmul.f32 -1.442695, %v3992_v16 }
 0x143   :  { %3510 = vpow2.f32 %v2874_v18 }
 0x14b   :  { %v3509_v17 = vpop.eup %3508 }
 0x14c   :  { %221 = vrot.lane.b32.xlu0 %v3509_v17, %s3823_s17 }
 0x14d   :  { %v3511_v19 = vpop.eup %3510 }
 0x14e   :  { %v215_v20 = vadd.f32 1.0, %v3511_v19 }
 0x150   :  { %3512 = vrcp.f32 %v215_v20 }
 0x15a   :  { %v3513_v21 = vpop.eup %3512 }
 0x15b   :  { %v219_v24 = vmul.f32 0.0, %v3513_v21 }
 0x1be   :  { %v222_v22 = vpop.permute.xlu0 %221 }
 0x1bf   :  { %v224_v23 = vmul.f32 %v3513_v21, %v222_v22 }
 0x1c1   :  { %226 = vrot.lane.b32.xlu0 %v224_v23, %s3824_s3 }
 0x233   :  { %v227_v25 = vpop.permute.xlu0 %226 }
 0x234   :  { %v229_v26 = vadd.f32 %v227_v25, %v219_v24 }
 0x236   :  { %3514 = vtanh.f32 %v229_v26  ;;  %v327_v50 = vrot.slane %v229_v26, 6 }
 0x240   :  { %v3515_v35 = vpop.eup %3514 }
 0x241   :  { %232 = vrot.lane.b32.xlu1 %v3515_v35, %s3823_s17 }
 0x2b3   :  { %v233_v36 = vpop.permute.xlu1 %232 }
 0x2b4   :  { %v235_v37 = vmul.f32 %v3513_v21, %v233_v36 }
 0x2b6   :  { %237 = vrot.lane.b32.xlu1 %v235_v37, %s3824_s3 }
 0x328   :  { %v238_v38 = vpop.permute.xlu1 %237 }
 0x329   :  { %241 = vst.msk [vmem:[#allocation2] sm:$0x3] %vm240_vm2, %v238_v38  ;;  %3081 = vmatmul.mubr.msk.f32.vlgmr.msra.gmra.mrb[0].mxu1 %vm242_vm3, %v238_v38 }
 0x32a   :  { %3356 = vmatpush3.bf16.msra.mxu1 %v4008_v31  ;;  %3091 = vmatprep.mubr.msk.f32.mxu1 %vm3826_vm1, %v3827_v33 }
 0x32b   :  { %3357 = vmatprep.subr.bf16.mxu1 %v3825_v30 }
 0x32e   :  { %3359 = vmatpush3.bf16.msra.mxu1 %v4019_v34 }
 0x32f   :  { %3366 = vmatprep.subr.bf16.mxu1 %v3825_v30 }
 0x3fc   :  { %v311_v39 = vpop.f32.mrb[0].mxu1 }
 0x3fd   :  { %v316_v40 = vrot.slane %v311_v39, 6  ;;  %v3082_v41 = vpop.f32.mrb[1].mxu1 }
 0x3ff   :  { %v318_v42 = vadd.f32 %v316_v40, %v3992_v16 }
 0x401   :  { %3516 = vtanh.f32 %v318_v42  ;;  %v2876_v44 = vmul.f32 -1.442695, %v318_v42 }
 0x403   :  { %3518 = vpow2.f32 %v2876_v44 }
 0x40b   :  { %v3517_v43 = vpop.eup %3516 }
 0x40c   :  { %331 = vrot.lane.b32.xlu0 %v3517_v43, %s3823_s17 }
 0x40d   :  { %v3519_v45 = vpop.eup %3518 }
 0x40e   :  { %v322_v46 = vadd.f32 1.0, %v3519_v45 }
 0x410   :  { %3520 = vrcp.f32 %v322_v46 }
 0x41a   :  { %v3521_v47 = vpop.eup %3520 }
 0x41b   :  { %v329_v51 = vmul.f32 %v3521_v47, %v327_v50 }
 0x47e   :  { %v332_v48 = vpop.permute.xlu0 %331 }
 0x47f   :  { %v334_v49 = vmul.f32 %v3521_v47, %v332_v48 }
 0x481   :  { %336 = vrot.lane.b32.xlu1 %v334_v49, %s3824_s3 }
 0x4f3   :  { %v337_v52 = vpop.permute.xlu1 %336 }
 0x4f4   :  { %v339_v53 = vadd.f32 %v337_v52, %v329_v51 }
 0x4f6   :  { %3522 = vtanh.f32 %v339_v53  ;;  %v439_v6 = vrot.slane %v339_v53, 6 }
 0x500   :  { %v3523_v54 = vpop.eup %3522 }
 0x501   :  { %342 = vrot.lane.b32.xlu0 %v3523_v54, %s3823_s17 }
 0x573   :  { %v343_v55 = vpop.permute.xlu0 %342 }
 0x574   :  { %v4042_v56 = vmul.f32 %v3521_v47, %v343_v55 }
 0x576   :  { %v352_v57 = vrot.slane %v4042_v56, 2 }
 0x578   :  { %353 = vrot.lane.b32.xlu1 %v352_v57, %s3824_s3 }
 0x5ea   :  { %v354_v58 = vpop.permute.xlu1 %353 }
 0x5eb   :  { %3092 = vmatmul.mubr.msk.f32.vlgmr.msra.gmra.mrb[2].mxu1 %vm242_vm3, %v354_v58 }
 0x5ec   :  { %3368 = vmatpush3.bf16.msra.mxu1 %v4008_v31  ;;  %3113 = vmatprep.mubr.msk.f32.mxu1 %vm3826_vm1, %v3827_v33 }
 0x5ed   :  { %3369 = vmatprep.subr.bf16.mxu1 %v3825_v30 }
 0x5f0   :  { %3371 = vmatpush3.bf16.msra.mxu1 %v4019_v34 }
 0x5f1   :  { %3378 = vmatprep.subr.bf16.mxu1 %v3825_v30 }
 0x6be   :  { %v423_v59 = vpop.f32.mrb[2].mxu1 }
 0x6bf   :  { %v428_v60 = vrot.slane %v423_v59, 4  ;;  %v3093_v61 = vpop.f32.mrb[3].mxu1 }
 0x6c1   :  { %v430_v62 = vadd.f32 %v428_v60, %v3992_v16 }
 0x6c3   :  { %3524 = vtanh.f32 %v430_v62  ;;  %v2878_v0 = vmul.f32 -1.442695, %v430_v62 }
 0x6c5   :  { %3526 = vpow2.f32 %v2878_v0 }
 0x6cd   :  { %v3525_v63 = vpop.eup %3524 }
 0x6ce   :  { %443 = vrot.lane.b32.xlu0 %v3525_v63, %s3823_s17 }
 0x6cf   :  { %v3527_v1 = vpop.eup %3526 }
 0x6d0   :  { %v434_v2 = vadd.f32 1.0, %v3527_v1 }
 0x6d2   :  { %3528 = vrcp.f32 %v434_v2 }
 0x6dc   :  { %v3529_v3 = vpop.eup %3528 }
 0x6dd   :  { %v441_v7 = vmul.f32 %v3529_v3, %v439_v6 }
 0x740   :  { %v444_v4 = vpop.permute.xlu0 %443 }
 0x741   :  { %v446_v5 = vmul.f32 %v3529_v3, %v444_v4 }
 0x743   :  { %448 = vrot.lane.b32.xlu1 %v446_v5, %s3824_s3 }
 0x7b5   :  { %v449_v8 = vpop.permute.xlu1 %448 }
 0x7b6   :  { %v451_v9 = vadd.f32 %v449_v8, %v441_v7 }
 0x7b8   :  { %3530 = vtanh.f32 %v451_v9  ;;  %v551_v28 = vrot.slane %v451_v9, 6 }
 0x7c2   :  { %v3531_v10 = vpop.eup %3530 }
 0x7c3   :  { %454 = vrot.lane.b32.xlu0 %v3531_v10, %s3823_s17 }
 0x835   :  { %v455_v11 = vpop.permute.xlu0 %454 }
 0x836   :  { %v4057_v12 = vmul.f32 %v3529_v3, %v455_v11 }
 0x838   :  { %v464_v13 = vrot.slane %v4057_v12, 4 }
 0x83a   :  { %465 = vrot.lane.b32.xlu1 %v464_v13, %s3824_s3 }
 0x8ac   :  { %v466_v15 = vpop.permute.xlu1 %465 }
 0x8ad   :  { %3103 = vmatmul.mubr.msk.f32.vlgmr.msra.gmra.mrb[2].mxu0 %vm242_vm3, %v466_v15 }
 0x8ae   :  { %3374 = vmatpush3.bf16.msra.mxu0 %v4008_v31  ;;  %3124 = vmatprep.mubr.msk.f32.mxu0 %vm3826_vm1, %v3827_v33 }
 0x8af   :  { %3375 = vmatprep.subr.bf16.mxu0 %v3825_v30 }
 0x8b2   :  { %3377 = vmatpush3.bf16.msra.mxu0 %v4019_v34 }
 0x8b3   :  { %3384 = vmatprep.subr.bf16.mxu0 %v3825_v30 }
 0x980   :  { %v535_v17 = vpop.f32.mrb[2].mxu0 }
 0x981   :  { %v540_v18 = vrot.slane %v535_v17, 2  ;;  %v3104_v19 = vpop.f32.mrb[3].mxu0 }
 0x983   :  { %v542_v20 = vadd.f32 %v540_v18, %v3992_v16 }
 0x985   :  { %3532 = vtanh.f32 %v542_v20  ;;  %v2880_v22 = vmul.f32 -1.442695, %v542_v20 }
 0x987   :  { %3534 = vpow2.f32 %v2880_v22 }
 0x98f   :  { %v3533_v21 = vpop.eup %3532 }
 0x990   :  { %555 = vrot.lane.b32.xlu0 %v3533_v21, %s3823_s17 }
 0x991   :  { %v3535_v23 = vpop.eup %3534 }
 0x992   :  { %v546_v24 = vadd.f32 1.0, %v3535_v23 }
 0x994   :  { %3536 = vrcp.f32 %v546_v24 }
 0x99e   :  { %v3537_v25 = vpop.eup %3536 }
 0x99f   :  { %v553_v29 = vmul.f32 %v3537_v25, %v551_v28 }
 0xa02   :  { %v556_v26 = vpop.permute.xlu0 %555 }
 0xa03   :  { %v558_v27 = vmul.f32 %v3537_v25, %v556_v26 }
 0xa05   :  { %560 = vrot.lane.b32.xlu1 %v558_v27, %s3824_s3 }
 0xa77   :  { %v561_v32 = vpop.permute.xlu1 %560 }
 0xa78   :  { %v563_v35 = vadd.f32 %v561_v32, %v553_v29 }
 0xa7a   :  { %3538 = vtanh.f32 %v563_v35  ;;  %v660_v50 = vrot.slane %v563_v35, 6 }
 0xa84   :  { %v3539_v16 = vpop.eup %3538 }
 0xa85   :  { %566 = vrot.lane.b32.xlu0 %v3539_v16, %s3823_s17 }
 0xaf7   :  { %v567_v36 = vpop.permute.xlu0 %566 }
 0xaf8   :  { %v4072_v37 = vmul.f32 %v3537_v25, %v567_v36 }
 0xafa   :  { %v576_v38 = vrot.slane %v4072_v37, 6 }
 0xafc   :  { %577 = vrot.lane.b32.xlu1 %v576_v38, %s3824_s3 }
 0xb6e   :  { %v578_v39 = vpop.permute.xlu1 %577 }
 0xb6f   :  { %3114 = vmatmul.mubr.msk.f32.vlgmr.msra.gmra.mrb[4].mxu1 %vm242_vm3, %v578_v39 }
 0xb70   :  { %3380 = vmatpush3.bf16.msra.mxu1 %v4008_v31  ;;  %3135 = vmatprep.mubr.msk.f32.mxu1 %vm3826_vm1, %v3827_v33 }
 0xb71   :  { %3381 = vmatprep.subr.bf16.mxu1 %v3825_v30 }
 0xb74   :  { %3383 = vmatpush3.bf16.msra.mxu1 %v4019_v34 }
 0xc42   :  { %v647_v40 = vpop.f32.mrb[4].mxu1 }
 0xc43   :  { %v651_v41 = vadd.f32 %v647_v40, %v3990_v14  ;;  %v3115_v42 = vpop.f32.mrb[5].mxu1 }
 0xc45   :  { %3540 = vtanh.f32 %v651_v41  ;;  %v2882_v44 = vmul.f32 -1.442695, %v651_v41 }
 0xc47   :  { %3542 = vpow2.f32 %v2882_v44 }
 0xc4f   :  { %v3541_v43 = vpop.eup %3540 }
 0xc50   :  { %664 = vrot.lane.b32.xlu0 %v3541_v43, %s3823_s17 }
 0xc51   :  { %v3543_v45 = vpop.eup %3542 }
 0xc52   :  { %v655_v46 = vadd.f32 1.0, %v3543_v45 }
 0xc54   :  { %3544 = vrcp.f32 %v655_v46 }
 0xc5e   :  { %v3545_v47 = vpop.eup %3544 }
 0xc5f   :  { %v662_v51 = vmul.f32 %v3545_v47, %v660_v50 }
 0xcc2   :  { %v665_v48 = vpop.permute.xlu0 %664 }
 0xcc3   :  { %v667_v49 = vmul.f32 %v3545_v47, %v665_v48 }
 0xcc5   :  { %669 = vrot.lane.b32.xlu1 %v667_v49, %s3824_s3 }
 0xd37   :  { %v670_v52 = vpop.permute.xlu1 %669 }
 0xd38   :  { %v672_v53 = vadd.f32 %v670_v52, %v662_v51 }
 0xd3a   :  { %3546 = vtanh.f32 %v672_v53 }
 0xd44   :  { %v3547_v54 = vpop.eup %3546 }
 0xd45   :  { %675 = vrot.lane.b32.xlu0 %v3547_v54, %s3823_s17 }
 0xdb7   :  { %v676_v55 = vpop.permute.xlu0 %675 }
 0xdb8   :  { %v678_v57 = vmul.f32 %v3545_v47, %v676_v55 }
 0xdba   :  { %680 = vrot.lane.b32.xlu1 %v678_v57, %s3824_s3 }
 0xe2c   :  { %v681_v58 = vpop.permute.xlu1 %680 }
 0xe2d   :  { %683 = vst.msk [vmem:[#allocation2 + $0x8] sm:$0x3] %vm240_vm2, %v681_v58  ;;  %3125 = vmatmul.mubr.msk.f32.vlgmr.msra.gmra.mrb[4].mxu0 %vm242_vm3, %v681_v58  ;;  %v1017_v58 = vld [vmem:[#allocation8 + $0x8] sm:$0xff] }
 0xe2e   :  { %3386 = vmatpush3.bf16.msra.mxu0 %v4008_v31  ;;  %3146 = vmatprep.mubr.msk.f32.mxu0 %vm3826_vm1, %v3827_v33 }
 0xe2f   :  { %3387 = vmatprep.subr.bf16.mxu0 %v3825_v30 }
 0xe32   :  { %3389 = vmatpush3.bf16.msra.mxu0 %v4019_v34  ;;  %v768_v34 = vrot.slane %v672_v53, 6 }
 0xe33   :  { %3398 = vmatprep.subr.bf16.mxu0 %v3825_v30 }
 0xf00   :  { %v752_v59 = vpop.f32.mrb[4].mxu0 }
 0xf01   :  { %v757_v60 = vrot.slane %v752_v59, 6  ;;  %v3126_v61 = vpop.f32.mrb[5].mxu0 }
 0xf02   :  { %v1019_v61 = vld [vmem:[#allocation8 + $0x18] sm:$0xff] }
 0xf03   :  { %v759_v62 = vadd.f32 %v757_v60, %v3990_v14  ;;  %v1018_v60 = vld [vmem:[#allocation8 + $0x10] sm:$0xff] }
 0xf05   :  { %3548 = vtanh.f32 %v759_v62  ;;  %v2884_v0 = vmul.f32 -1.442695, %v759_v62  ;;  %v3394_v62 = vpack.c.bf16 %v1019_v61, %v1018_v60 }
 0xf07   :  { %3550 = vpow2.f32 %v2884_v0 }
 0xf0f   :  { %v3549_v63 = vpop.eup %3548 }
 0xf10   :  { %772 = vrot.lane.b32.xlu0 %v3549_v63, %s3823_s17 }
 0xf11   :  { %v3551_v31 = vpop.eup %3550 }
 0xf12   :  { %v763_v1 = vadd.f32 1.0, %v3551_v31 }
 0xf14   :  { %3552 = vrcp.f32 %v763_v1 }
 0xf1e   :  { %v3553_v2 = vpop.eup %3552 }
 0xf1f   :  { %v770_v5 = vmul.f32 %v3553_v2, %v768_v34 }
 0xf82   :  { %v773_v3 = vpop.permute.xlu0 %772 }
 0xf83   :  { %v775_v4 = vmul.f32 %v3553_v2, %v773_v3 }
 0xf85   :  { %777 = vrot.lane.b32.xlu1 %v775_v4, %s3824_s3  ;;  %v2889_v4 = vld [vmem:[%s4402_s6] ss:$0 sm:$0xff] }
 0xff7   :  { %v778_v6 = vpop.permute.xlu1 %777 }
 0xff8   :  { %v780_v7 = vadd.f32 %v778_v6, %v770_v5 }
 0xffa   :  { %3554 = vtanh.f32 %v780_v7  ;;  %v879_v27 = vrot.slane %v780_v7, 6 }
0x1004   :  { %v3555_v8 = vpop.eup %3554 }
0x1005   :  { %783 = vrot.lane.b32.xlu0 %v3555_v8, %s3823_s17 }
0x1077   :  { %v784_v9 = vpop.permute.xlu0 %783 }
0x1078   :  { %v4099_v10 = vmul.f32 %v3553_v2, %v784_v9 }
0x107a   :  { %v792_v11 = vrot.slane %v4099_v10, 2 }
0x107c   :  { %793 = vrot.lane.b32.xlu1 %v792_v11, %s3824_s3 }
0x10ee   :  { %v794_v13 = vpop.permute.xlu1 %793 }
0x10ef   :  { %3136 = vmatmul.mubr.msk.f32.vlgmr.msra.gmra.mrb[6].mxu1 %vm242_vm3, %v794_v13 }
0x11c2   :  { %v863_v15 = vpop.f32.mrb[6].mxu1 }
0x11c3   :  { %v868_v17 = vrot.slane %v863_v15, 4  ;;  %v3137_v18 = vpop.f32.mrb[7].mxu1 }
0x11c5   :  { %v870_v19 = vadd.f32 %v868_v17, %v3990_v14 }
0x11c7   :  { %3556 = vtanh.f32 %v870_v19  ;;  %v2886_v21 = vmul.f32 -1.442695, %v870_v19 }
0x11c9   :  { %3558 = vpow2.f32 %v2886_v21  ;;  %v1020_v21 = vld [vmem:[#allocation9] sm:$0xff] }
0x11d1   :  { %v3557_v20 = vpop.eup %3556 }
0x11d2   :  { %883 = vrot.lane.b32.xlu0 %v3557_v20, %s3823_s17 }
0x11d3   :  { %v3559_v22 = vpop.eup %3558 }
0x11d4   :  { %v874_v23 = vadd.f32 1.0, %v3559_v22  ;;  %v1021_v22 = vld [vmem:[#allocation9 + $0x8] sm:$0xff] }
0x11d6   :  { %3560 = vrcp.f32 %v874_v23  ;;  %v1022_v23 = vld [vmem:[#allocation9 + $0x10] sm:$0xff] }
0x11e0   :  { %v3561_v24 = vpop.eup %3560 }
0x11e1   :  { %v881_v28 = vmul.f32 %v3561_v24, %v879_v27 }
0x1244   :  { %v884_v25 = vpop.permute.xlu0 %883 }
0x1245   :  { %v886_v26 = vmul.f32 %v3561_v24, %v884_v25  ;;  %v1023_v25 = vld [vmem:[#allocation9 + $0x18] sm:$0xff] }
0x1247   :  { %888 = vrot.lane.b32.xlu1 %v886_v26, %s3824_s3  ;;  %v4151_v26 = vpack.c.bf16 %v1023_v25, %v1022_v23 }
0x12b9   :  { %v889_v29 = vpop.permute.xlu1 %888 }
0x12ba   :  { %v891_v32 = vadd.f32 %v889_v29, %v881_v28 }
0x12bc   :  { %3562 = vtanh.f32 %v891_v32 }
0x12c6   :  { %v3563_v35 = vpop.eup %3562 }
0x12c7   :  { %894 = vrot.lane.b32.xlu0 %v3563_v35, %s3823_s17 }
0x1339   :  { %v895_v16 = vpop.permute.xlu0 %894 }
0x133a   :  { %v897_v36 = vmul.f32 %v3561_v24, %v895_v16  ;;  %v4148_v24 = vpack.c.bf16 %v1021_v22, %v1020_v21 }
0x133c   :  { %v903_v38 = vrot.slane %v897_v36, 4 }
0x133e   :  { %904 = vrot.lane.b32.xlu1 %v903_v38, %s3824_s3 }
0x13b0   :  { %v905_v39 = vpop.permute.xlu1 %904 }
0x13b1   :  { %3147 = vmatmul.mubr.msk.f32.vlgmr.msra.gmra.mrb[6].mxu0 %vm242_vm3, %v905_v39 }
0x13b2   :  { %3168 = vmatprep.mubr.msk.f32.mxu0 %vm3826_vm1, %v3827_v33  ;;  %3400 = vmatpush3.bf16.msra.mxu0 %v4148_v24 }
0x13b3   :  { %3401 = vmatprep.subr.bf16.mxu0 %v3825_v30 }
0x13b6   :  { %3403 = vmatpush3.bf16.msra.mxu0 %v4151_v26 }
0x13b7   :  { %3410 = vmatprep.subr.bf16.mxu0 %v3825_v30 }
0x1484   :  { %v974_v40 = vpop.f32.mrb[6].mxu0 }
0x1485   :  { %v979_v41 = vrot.slane %v974_v40, 2  ;;  %v3148_v42 = vpop.f32.mrb[7].mxu0 }
0x1487   :  { %v981_v43 = vadd.f32 %v979_v41, %v3990_v14  ;;  %v990_v14 = vrot.slane %v891_v32, 6 }
0x1489   :  { %3564 = vtanh.f32 %v981_v43  ;;  %v2888_v45 = vmul.f32 -1.442695, %v981_v43 }
0x148b   :  { %3566 = vpow2.f32 %v2888_v45 }
0x1493   :  { %v3565_v44 = vpop.eup %3564 }
0x1494   :  { %994 = vrot.lane.b32.xlu0 %v3565_v44, %s3823_s17 }
0x1495   :  { %v3567_v46 = vpop.eup %3566 }
0x1496   :  { %v985_v47 = vadd.f32 1.0, %v3567_v46 }
0x1498   :  { %3568 = vrcp.f32 %v985_v47 }
0x14a2   :  { %v3569_v48 = vpop.eup %3568 }
0x14a3   :  { %v992_v51 = vmul.f32 %v3569_v48, %v990_v14 }
0x1506   :  { %v995_v49 = vpop.permute.xlu0 %994 }
0x1507   :  { %v997_v50 = vmul.f32 %v3569_v48, %v995_v49 }
0x1509   :  { %999 = vrot.lane.b32.xlu1 %v997_v50, %s3824_s3 }
0x150d   :  { %347 = vrot.lane.b32.xlu1 %v4042_v56, %s3824_s3 }
0x1511   :  { %571 = vrot.lane.b32.xlu1 %v4072_v37, %s3824_s3  ;;  %v1016_v37 = vld [vmem:[#allocation8] sm:$0xff] }
0x1512   :  { %v3390_v59 = vpack.c.bf16 %v1017_v58, %v1016_v37 }
0x1514   :  { %3391 = vmatprep.subr.bf16.mxu1 %v3390_v59 }
0x1515   :  { %899 = vrot.lane.b32.xlu1 %v897_v36, %s3824_s3  ;;  %3393 = vmatpush3.bf16.msra.mxu1 %v3390_v59 }
0x1516   :  { %3395 = vmatprep.subr.bf16.mxu1 %v3394_v62 }
0x1519   :  { %3397 = vmatpush3.bf16.msra.mxu1 %v3394_v62 }
0x151a   :  { %3404 = vmatprep.subr.bf16.mxu1 %v3825_v30 }
0x157b   :  { %v1000_v52 = vpop.permute.xlu1 %999 }
0x157c   :  { %v1002_v53 = vadd.f32 %v1000_v52, %v992_v51 }
0x157e   :  { %3570 = vtanh.f32 %v1002_v53 }
0x157f   :  { %v348_v54 = vpop.permute.xlu1 %347 }
0x1580   :  { %351 = vst.msk [vmem:[#allocation2] sm:$0xc] %vm350_vm4, %v348_v54 }
0x1583   :  { %v572_v55 = vpop.permute.xlu1 %571 }
0x1584   :  { %575 = vst.msk [vmem:[#allocation2] sm:$0xc0] %vm574_vm5, %v572_v55 }
0x1587   :  { %v900_v56 = vpop.permute.xlu1 %899 }
0x1588   :  { %v3571_v57 = vpop.eup %3570  ;;  %902 = vst.msk [vmem:[#allocation2 + $0x8] sm:$0x30] %vm462_vm6, %v900_v56 }
0x1589   :  { %1005 = vrot.lane.b32.xlu0 %v3571_v57, %s3823_s17 }
0x158d   :  { %459 = vrot.lane.b32.xlu0 %v4057_v12, %s3824_s3 }
0x1591   :  { %788 = vrot.lane.b32.xlu0 %v4099_v10, %s3824_s3 }
0x15fb   :  { %v1006_v63 = vpop.permute.xlu0 %1005 }
0x15fc   :  { %v1008_v0 = vmul.f32 %v3569_v48, %v1006_v63 }
0x15fe   :  { %1010 = vrot.lane.b32.xlu0 %v1008_v0, %s3824_s3 }
0x15ff   :  { %v460_v12 = vpop.permute.xlu0 %459 }
0x1600   :  { %463 = vst.msk [vmem:[#allocation2] sm:$0x30] %vm462_vm6, %v460_v12 }
0x1603   :  { %v789_v31 = vpop.permute.xlu0 %788 }
0x1604   :  { %791 = vst.msk [vmem:[#allocation2 + $0x8] sm:$0xc] %vm350_vm4, %v789_v31 }
0x1607   :  { %v1014_v1 = vld [vmem:[#allocation2] sm:$0xff] }
0x1608   :  { %3157 = vmatprep.mubr.msk.f32.mxu1 %vm242_vm3, %v1014_v1 }
0x1670   :  { %v1011_v2 = vpop.permute.xlu0 %1010 }
0x1671   :  { %1013 = vst.msk [vmem:[#allocation2 + $0x8] sm:$0xc0] %vm574_vm5, %v1011_v2 }
0x1678   :  { %v1015_v3 = vld [vmem:[#allocation2 + $0x8] sm:$0xff] }
0x1679   :  { %3158 = vmatmul.mubr.msk.f32.vlgmr.msra.gmra.mrb[8].mxu1 %vm242_vm3, %v1015_v3 }
0x167a   :  { %3179 = vmatprep.mubr.msk.f32.mxu1 %vm3826_vm1, %v3827_v33  ;;  %3406 = vmatpush3.bf16.msra.mxu1 %v4148_v24 }
0x167b   :  { %3407 = vmatprep.subr.bf16.mxu1 %v3825_v30 }
0x167e   :  { %3409 = vmatpush3.bf16.msra.mxu1 %v4151_v26 }
0x167f   :  { %3416 = vmatprep.subr.bf16.mxu1 %v3825_v30 }
0x174c   :  { %v3159_v34 = vpop.f32.mrb[8].mxu1 }
0x174d   :  { %v4140_v5 = vadd.f32 %v3159_v34, %v2889_v4  ;;  %v1103_v6 = vpop.f32.mrb[9].mxu1 }
0x174e   :  { %v4142_v7 = vadd.f32 %v2889_v4, %v1103_v6 }
0x1750   :  { %3572 = vtanh.f32 %v4142_v7  ;;  %v2892_v9 = vmul.f32 -1.442695, %v4142_v7 }
0x1752   :  { %3574 = vpow2.f32 %v2892_v9 }
0x175a   :  { %v3573_v8 = vpop.eup %3572 }
0x175b   :  { %1121 = vrot.lane.b32.xlu1 %v3573_v8, %s3823_s17 }
0x175c   :  { %v3575_v10 = vpop.eup %3574 }
0x175d   :  { %v1115_v11 = vadd.f32 1.0, %v3575_v10 }
0x175f   :  { %3576 = vrcp.f32 %v1115_v11 }
0x1769   :  { %v3577_v13 = vpop.eup %3576 }
0x176a   :  { %v1119_v18 = vmul.f32 0.0, %v3577_v13 }
0x17cd   :  { %v1122_v15 = vpop.permute.xlu1 %1121 }
0x17ce   :  { %v1124_v17 = vmul.f32 %v3577_v13, %v1122_v15 }
0x17d0   :  { %1126 = vrot.lane.b32.xlu0 %v1124_v17, %s3824_s3 }
0x1842   :  { %v1127_v19 = vpop.permute.xlu0 %1126 }
0x1843   :  { %v1129_v20 = vadd.f32 %v1127_v19, %v1119_v18 }
0x1845   :  { %3578 = vtanh.f32 %v1129_v20  ;;  %v1225_v46 = vrot.slane %v1129_v20, 6 }
0x184f   :  { %v3579_v27 = vpop.eup %3578 }
0x1850   :  { %1132 = vrot.lane.b32.xlu1 %v3579_v27, %s3823_s17 }
0x18c2   :  { %v1133_v28 = vpop.permute.xlu1 %1132 }
0x18c3   :  { %v1135_v29 = vmul.f32 %v3577_v13, %v1133_v28 }
0x18c5   :  { %1137 = vrot.lane.b32.xlu0 %v1135_v29, %s3824_s3 }
0x1937   :  { %v1138_v32 = vpop.permute.xlu0 %1137 }
0x1938   :  { %1140 = vst.msk [vmem:[#allocation2] sm:$0x3] %vm240_vm2, %v1138_v32  ;;  %3169 = vmatmul.mubr.msk.f32.vlgmr.msra.gmra.mrb[8].mxu0 %vm242_vm3, %v1138_v32 }
0x1939   :  { %3412 = vmatpush3.bf16.msra.mxu0 %v4148_v24  ;;  %3190 = vmatprep.mubr.msk.f32.mxu0 %vm3826_vm1, %v3827_v33 }
0x193a   :  { %3413 = vmatprep.subr.bf16.mxu0 %v3825_v30 }
0x193d   :  { %3415 = vmatpush3.bf16.msra.mxu0 %v4151_v26 }
0x193e   :  { %3422 = vmatprep.subr.bf16.mxu0 %v3825_v30 }
0x1a0b   :  { %v1209_v35 = vpop.f32.mrb[8].mxu0 }
0x1a0c   :  { %v1214_v16 = vrot.slane %v1209_v35, 6  ;;  %v3170_v36 = vpop.f32.mrb[9].mxu0 }
0x1a0e   :  { %v1216_v38 = vadd.f32 %v1214_v16, %v4142_v7 }
0x1a10   :  { %3580 = vtanh.f32 %v1216_v38  ;;  %v2894_v40 = vmul.f32 -1.442695, %v1216_v38 }
0x1a12   :  { %3582 = vpow2.f32 %v2894_v40 }
0x1a1a   :  { %v3581_v39 = vpop.eup %3580 }
0x1a1b   :  { %1229 = vrot.lane.b32.xlu1 %v3581_v39, %s3823_s17 }
0x1a1c   :  { %v3583_v41 = vpop.eup %3582 }
0x1a1d   :  { %v1220_v42 = vadd.f32 1.0, %v3583_v41 }
0x1a1f   :  { %3584 = vrcp.f32 %v1220_v42 }
0x1a29   :  { %v3585_v43 = vpop.eup %3584 }
0x1a2a   :  { %v1227_v47 = vmul.f32 %v3585_v43, %v1225_v46 }
0x1a8d   :  { %v1230_v44 = vpop.permute.xlu1 %1229 }
0x1a8e   :  { %v1232_v45 = vmul.f32 %v3585_v43, %v1230_v44 }
0x1a90   :  { %1234 = vrot.lane.b32.xlu0 %v1232_v45, %s3824_s3 }
0x1b02   :  { %v1235_v48 = vpop.permute.xlu0 %1234 }
0x1b03   :  { %v1237_v49 = vadd.f32 %v1235_v48, %v1227_v47 }
0x1b05   :  { %3586 = vtanh.f32 %v1237_v49  ;;  %v1336_v0 = vrot.slane %v1237_v49, 6 }
0x1b0f   :  { %v3587_v50 = vpop.eup %3586 }
0x1b10   :  { %1240 = vrot.lane.b32.xlu1 %v3587_v50, %s3823_s17 }
0x1b82   :  { %v1241_v14 = vpop.permute.xlu1 %1240 }
0x1b83   :  { %v4174_v51 = vmul.f32 %v3585_v43, %v1241_v14 }
0x1b85   :  { %v1249_v52 = vrot.slane %v4174_v51, 2 }
0x1b87   :  { %1250 = vrot.lane.b32.xlu0 %v1249_v52, %s3824_s3 }
0x1bf9   :  { %v1251_v53 = vpop.permute.xlu0 %1250 }
0x1bfa   :  { %3180 = vmatmul.mubr.msk.f32.vlgmr.msra.gmra.mrb[10].mxu1 %vm242_vm3, %v1251_v53 }
0x1bfb   :  { %3418 = vmatpush3.bf16.msra.mxu1 %v4148_v24  ;;  %3201 = vmatprep.mubr.msk.f32.mxu1 %vm3826_vm1, %v3827_v33 }
0x1bfc   :  { %3419 = vmatprep.subr.bf16.mxu1 %v3825_v30 }
0x1bff   :  { %3421 = vmatpush3.bf16.msra.mxu1 %v4151_v26 }
0x1c00   :  { %3428 = vmatprep.subr.bf16.mxu1 %v3825_v30 }
0x1ccd   :  { %v1320_v54 = vpop.f32.mrb[10].mxu1 }
0x1cce   :  { %v1325_v55 = vrot.slane %v1320_v54, 4  ;;  %v3181_v56 = vpop.f32.mrb[11].mxu1 }
0x1cd0   :  { %v1327_v57 = vadd.f32 %v1325_v55, %v4142_v7 }
0x1cd2   :  { %3588 = vtanh.f32 %v1327_v57  ;;  %v2896_v58 = vmul.f32 -1.442695, %v1327_v57 }
0x1cd4   :  { %3590 = vpow2.f32 %v2896_v58 }
0x1cdc   :  { %v3589_v37 = vpop.eup %3588 }
0x1cdd   :  { %1340 = vrot.lane.b32.xlu1 %v3589_v37, %s3823_s17 }
0x1cde   :  { %v3591_v59 = vpop.eup %3590 }
0x1cdf   :  { %v1331_v60 = vadd.f32 1.0, %v3591_v59 }
0x1ce1   :  { %3592 = vrcp.f32 %v1331_v60 }
0x1ceb   :  { %v3593_v61 = vpop.eup %3592 }
0x1cec   :  { %v1338_v12 = vmul.f32 %v3593_v61, %v1336_v0 }
0x1d4f   :  { %v1341_v62 = vpop.permute.xlu1 %1340 }
0x1d50   :  { %v1343_v63 = vmul.f32 %v3593_v61, %v1341_v62 }
0x1d52   :  { %1345 = vrot.lane.b32.xlu0 %v1343_v63, %s3824_s3 }
0x1dc4   :  { %v1346_v31 = vpop.permute.xlu0 %1345 }
0x1dc5   :  { %v1348_v1 = vadd.f32 %v1346_v31, %v1338_v12 }
0x1dc7   :  { %3594 = vtanh.f32 %v1348_v1  ;;  %v1447_v22 = vrot.slane %v1348_v1, 6 }
0x1dd1   :  { %v3595_v2 = vpop.eup %3594 }
0x1dd2   :  { %1351 = vrot.lane.b32.xlu1 %v3595_v2, %s3823_s17 }
0x1e44   :  { %v1352_v3 = vpop.permute.xlu1 %1351 }
0x1e45   :  { %v4189_v4 = vmul.f32 %v3593_v61, %v1352_v3 }
0x1e47   :  { %v1360_v34 = vrot.slane %v4189_v4, 4 }
0x1e49   :  { %1361 = vrot.lane.b32.xlu0 %v1360_v34, %s3824_s3 }
0x1ebb   :  { %v1362_v6 = vpop.permute.xlu0 %1361 }
0x1ebc   :  { %3191 = vmatmul.mubr.msk.f32.vlgmr.msra.gmra.mrb[10].mxu0 %vm242_vm3, %v1362_v6 }
0x1ebd   :  { %3424 = vmatpush3.bf16.msra.mxu0 %v4148_v24  ;;  %3212 = vmatprep.mubr.msk.f32.mxu0 %vm3826_vm1, %v3827_v33 }
0x1ebe   :  { %3425 = vmatprep.subr.bf16.mxu0 %v3825_v30 }
0x1ec1   :  { %3427 = vmatpush3.bf16.msra.mxu0 %v4151_v26 }
0x1ec2   :  { %3434 = vmatprep.subr.bf16.mxu0 %v3825_v30 }
0x1f8f   :  { %v1431_v8 = vpop.f32.mrb[10].mxu0 }
0x1f90   :  { %v1436_v9 = vrot.slane %v1431_v8, 2  ;;  %v3192_v10 = vpop.f32.mrb[11].mxu0 }
0x1f92   :  { %v1438_v11 = vadd.f32 %v1436_v9, %v4142_v7 }
0x1f94   :  { %3596 = vtanh.f32 %v1438_v11  ;;  %v2898_v15 = vmul.f32 -1.442695, %v1438_v11 }
0x1f96   :  { %3598 = vpow2.f32 %v2898_v15 }
0x1f9e   :  { %v3597_v13 = vpop.eup %3596 }
0x1f9f   :  { %1451 = vrot.lane.b32.xlu1 %v3597_v13, %s3823_s17 }
0x1fa0   :  { %v3599_v17 = vpop.eup %3598 }
0x1fa1   :  { %v1442_v18 = vadd.f32 1.0, %v3599_v17 }
0x1fa3   :  { %3600 = vrcp.f32 %v1442_v18 }
0x1fad   :  { %v3601_v19 = vpop.eup %3600 }
0x1fae   :  { %v1449_v23 = vmul.f32 %v3601_v19, %v1447_v22 }
0x2011   :  { %v1452_v20 = vpop.permute.xlu1 %1451 }
0x2012   :  { %v1454_v21 = vmul.f32 %v3601_v19, %v1452_v20 }
0x2014   :  { %1456 = vrot.lane.b32.xlu0 %v1454_v21, %s3824_s3 }
0x2086   :  { %v1457_v25 = vpop.permute.xlu0 %1456 }
0x2087   :  { %v1459_v27 = vadd.f32 %v1457_v25, %v1449_v23 }
0x2089   :  { %3602 = vtanh.f32 %v1459_v27  ;;  %v1555_v46 = vrot.slane %v1459_v27, 6 }
0x2093   :  { %v3603_v7 = vpop.eup %3602 }
0x2094   :  { %1462 = vrot.lane.b32.xlu1 %v3603_v7, %s3823_s17 }
0x2106   :  { %v1463_v28 = vpop.permute.xlu1 %1462 }
0x2107   :  { %v4204_v29 = vmul.f32 %v3601_v19, %v1463_v28 }
0x2109   :  { %v1471_v32 = vrot.slane %v4204_v29, 6 }
0x210b   :  { %1472 = vrot.lane.b32.xlu0 %v1471_v32, %s3824_s3 }
0x217d   :  { %v1473_v35 = vpop.permute.xlu0 %1472 }
0x217e   :  { %3202 = vmatmul.mubr.msk.f32.vlgmr.msra.gmra.mrb[12].mxu1 %vm242_vm3, %v1473_v35 }
0x217f   :  { %3430 = vmatpush3.bf16.msra.mxu1 %v4148_v24  ;;  %3223 = vmatprep.mubr.msk.f32.mxu1 %vm3826_vm1, %v3827_v33 }
0x2180   :  { %3431 = vmatprep.subr.bf16.mxu1 %v3825_v30 }
0x2183   :  { %3433 = vmatpush3.bf16.msra.mxu1 %v4151_v26 }
0x2251   :  { %v1542_v16 = vpop.f32.mrb[12].mxu1 }
0x2252   :  { %v1546_v36 = vadd.f32 %v1542_v16, %v4140_v5  ;;  %v3203_v38 = vpop.f32.mrb[13].mxu1 }
0x2254   :  { %3604 = vtanh.f32 %v1546_v36  ;;  %v2900_v40 = vmul.f32 -1.442695, %v1546_v36 }
0x2256   :  { %3606 = vpow2.f32 %v2900_v40 }
0x225e   :  { %v3605_v39 = vpop.eup %3604 }
0x225f   :  { %1559 = vrot.lane.b32.xlu1 %v3605_v39, %s3823_s17 }
0x2260   :  { %v3607_v41 = vpop.eup %3606 }
0x2261   :  { %v1550_v42 = vadd.f32 1.0, %v3607_v41 }
0x2263   :  { %3608 = vrcp.f32 %v1550_v42 }
0x226d   :  { %v3609_v43 = vpop.eup %3608 }
0x226e   :  { %v1557_v47 = vmul.f32 %v3609_v43, %v1555_v46 }
0x22d1   :  { %v1560_v44 = vpop.permute.xlu1 %1559 }
0x22d2   :  { %v1562_v45 = vmul.f32 %v3609_v43, %v1560_v44 }
0x22d4   :  { %1564 = vrot.lane.b32.xlu0 %v1562_v45, %s3824_s3 }
0x2346   :  { %v1565_v48 = vpop.permute.xlu0 %1564 }
0x2347   :  { %v1567_v49 = vadd.f32 %v1565_v48, %v1557_v47 }
0x2349   :  { %3610 = vtanh.f32 %v1567_v49 }
0x2353   :  { %v3611_v50 = vpop.eup %3610 }
0x2354   :  { %1570 = vrot.lane.b32.xlu1 %v3611_v50, %s3823_s17 }
0x23c6   :  { %v1571_v14 = vpop.permute.xlu1 %1570 }
0x23c7   :  { %v1573_v52 = vmul.f32 %v3609_v43, %v1571_v14 }
0x23c9   :  { %1575 = vrot.lane.b32.xlu0 %v1573_v52, %s3824_s3 }
0x243b   :  { %v1576_v53 = vpop.permute.xlu0 %1575 }
0x243c   :  { %1578 = vst.msk [vmem:[#allocation2 + $0x8] sm:$0x3] %vm240_vm2, %v1576_v53  ;;  %3213 = vmatmul.mubr.msk.f32.vlgmr.msra.gmra.mrb[12].mxu0 %vm242_vm3, %v1576_v53 }
0x243d   :  { %3436 = vmatpush3.bf16.msra.mxu0 %v4148_v24  ;;  %3234 = vmatprep.mubr.msk.f32.mxu0 %vm3826_vm1, %v3827_v33 }
0x243e   :  { %3437 = vmatprep.subr.bf16.mxu0 %v3825_v30 }
0x2441   :  { %3439 = vmatpush3.bf16.msra.mxu0 %v4151_v26  ;;  %v1663_v26 = vrot.slane %v1567_v49, 6 }
0x2442   :  { %3448 = vmatprep.subr.bf16.mxu0 %v3825_v30 }
0x250f   :  { %v1647_v54 = vpop.f32.mrb[12].mxu0 }
0x2510   :  { %v1652_v55 = vrot.slane %v1647_v54, 6  ;;  %v3214_v56 = vpop.f32.mrb[13].mxu0 }
0x2511   :  { %v1914_v56 = vld [vmem:[#allocation11 + $0x18] sm:$0xff] }
0x2512   :  { %v1654_v57 = vadd.f32 %v1652_v55, %v4140_v5  ;;  %v1913_v55 = vld [vmem:[#allocation11 + $0x10] sm:$0xff] }
0x2514   :  { %3612 = vtanh.f32 %v1654_v57  ;;  %v2902_v58 = vmul.f32 -1.442695, %v1654_v57  ;;  %v3444_v57 = vpack.c.bf16 %v1914_v56, %v1913_v55 }
0x2516   :  { %3614 = vpow2.f32 %v2902_v58 }
0x251e   :  { %v3613_v37 = vpop.eup %3612 }
0x251f   :  { %1667 = vrot.lane.b32.xlu1 %v3613_v37, %s3823_s17 }
0x2520   :  { %v3615_v24 = vpop.eup %3614 }
0x2521   :  { %v1658_v59 = vadd.f32 1.0, %v3615_v24 }
0x2523   :  { %3616 = vrcp.f32 %v1658_v59 }
0x252d   :  { %v3617_v60 = vpop.eup %3616 }
0x252e   :  { %v1665_v63 = vmul.f32 %v3617_v60, %v1663_v26 }
0x2591   :  { %v1668_v61 = vpop.permute.xlu1 %1667 }
0x2592   :  { %v1670_v62 = vmul.f32 %v3617_v60, %v1668_v61 }
0x2594   :  { %1672 = vrot.lane.b32.xlu0 %v1670_v62, %s3824_s3  ;;  %v2907_v62 = vld [vmem:[%s4405_s9] ss:$0 sm:$0xff] }
0x2606   :  { %v1673_v0 = vpop.permute.xlu0 %1672 }
0x2607   :  { %v1675_v12 = vadd.f32 %v1673_v0, %v1665_v63 }
0x2609   :  { %3618 = vtanh.f32 %v1675_v12  ;;  %v1774_v21 = vrot.slane %v1675_v12, 6 }
0x2613   :  { %v3619_v31 = vpop.eup %3618 }
0x2614   :  { %1678 = vrot.lane.b32.xlu1 %v3619_v31, %s3823_s17 }
0x2686   :  { %v1679_v1 = vpop.permute.xlu1 %1678 }
0x2687   :  { %v4231_v2 = vmul.f32 %v3617_v60, %v1679_v1 }
0x2689   :  { %v1687_v3 = vrot.slane %v4231_v2, 2 }
0x268b   :  { %1688 = vrot.lane.b32.xlu0 %v1687_v3, %s3824_s3 }
0x26fd   :  { %v1689_v34 = vpop.permute.xlu0 %1688 }
0x26fe   :  { %3224 = vmatmul.mubr.msk.f32.vlgmr.msra.gmra.mrb[14].mxu1 %vm242_vm3, %v1689_v34 }
0x27d1   :  { %v1758_v6 = vpop.f32.mrb[14].mxu1 }
0x27d2   :  { %v1763_v8 = vrot.slane %v1758_v6, 4  ;;  %v3225_v9 = vpop.f32.mrb[15].mxu1 }
0x27d4   :  { %v1765_v10 = vadd.f32 %v1763_v8, %v4140_v5 }
0x27d6   :  { %3620 = vtanh.f32 %v1765_v10  ;;  %v2904_v13 = vmul.f32 -1.442695, %v1765_v10 }
0x27d8   :  { %3622 = vpow2.f32 %v2904_v13  ;;  %v1915_v13 = vld [vmem:[%s4404_s8] sm:$0xff] }
0x27e0   :  { %v3621_v11 = vpop.eup %3620 }
0x27e1   :  { %1778 = vrot.lane.b32.xlu1 %v3621_v11, %s3823_s17 }
0x27e2   :  { %v3623_v15 = vpop.eup %3622 }
0x27e3   :  { %v1769_v17 = vadd.f32 1.0, %v3623_v15  ;;  %v1916_v15 = vld [vmem:[%s4404_s8 + $0x8] sm:$0xff] }
0x27e5   :  { %3624 = vrcp.f32 %v1769_v17  ;;  %v1917_v17 = vld [vmem:[%s4404_s8 + $0x10] sm:$0xff] }
0x27ef   :  { %v3625_v18 = vpop.eup %3624 }
0x27f0   :  { %v1776_v22 = vmul.f32 %v3625_v18, %v1774_v21 }
0x2853   :  { %v1779_v19 = vpop.permute.xlu1 %1778 }
0x2854   :  { %v1781_v20 = vmul.f32 %v3625_v18, %v1779_v19  ;;  %v1918_v19 = vld [vmem:[%s4404_s8 + $0x18] sm:$0xff] }
0x2856   :  { %1783 = vrot.lane.b32.xlu0 %v1781_v20, %s3824_s3  ;;  %v4295_v20 = vpack.c.bf16 %v1918_v19, %v1917_v17 }
0x28c8   :  { %v1784_v23 = vpop.permute.xlu0 %1783 }
0x28c9   :  { %v1786_v25 = vadd.f32 %v1784_v23, %v1776_v22 }
0x28cb   :  { %3626 = vtanh.f32 %v1786_v25 }
0x28d5   :  { %v3627_v27 = vpop.eup %3626 }
0x28d6   :  { %1789 = vrot.lane.b32.xlu1 %v3627_v27, %s3823_s17 }
0x2948   :  { %v1790_v7 = vpop.permute.xlu1 %1789 }
0x2949   :  { %v1792_v28 = vmul.f32 %v3625_v18, %v1790_v7  ;;  %v4289_v18 = vpack.c.bf16 %v1916_v15, %v1915_v13 }
0x294b   :  { %v1798_v32 = vrot.slane %v1792_v28, 4 }
0x294d   :  { %1799 = vrot.lane.b32.xlu0 %v1798_v32, %s3824_s3 }
0x29bf   :  { %v1800_v35 = vpop.permute.xlu0 %1799 }
0x29c0   :  { %3235 = vmatmul.mubr.msk.f32.vlgmr.msra.gmra.mrb[14].mxu0 %vm242_vm3, %v1800_v35 }
0x29c1   :  { %3256 = vmatprep.mubr.msk.f32.mxu0 %vm3826_vm1, %v3827_v33  ;;  %3450 = vmatpush3.bf16.msra.mxu0 %v4289_v18 }
0x29c2   :  { %3451 = vmatprep.subr.bf16.mxu0 %v3825_v30 }
0x29c5   :  { %3453 = vmatpush3.bf16.msra.mxu0 %v4295_v20 }
0x29c6   :  { %3460 = vmatprep.subr.bf16.mxu0 %v3825_v30 }
0x2a93   :  { %v1869_v16 = vpop.f32.mrb[14].mxu0 }
0x2a94   :  { %v1874_v36 = vrot.slane %v1869_v16, 2  ;;  %v3236_v38 = vpop.f32.mrb[15].mxu0 }
0x2a96   :  { %v1876_v39 = vadd.f32 %v1874_v36, %v4140_v5  ;;  %v1885_v5 = vrot.slane %v1786_v25, 6 }
0x2a98   :  { %3628 = vtanh.f32 %v1876_v39  ;;  %v2906_v41 = vmul.f32 -1.442695, %v1876_v39 }
0x2a9a   :  { %3630 = vpow2.f32 %v2906_v41 }
0x2aa2   :  { %v3629_v40 = vpop.eup %3628 }
0x2aa3   :  { %1889 = vrot.lane.b32.xlu1 %v3629_v40, %s3823_s17 }
0x2aa4   :  { %v3631_v42 = vpop.eup %3630 }
0x2aa5   :  { %v1880_v43 = vadd.f32 1.0, %v3631_v42 }
0x2aa7   :  { %3632 = vrcp.f32 %v1880_v43 }
0x2ab1   :  { %v3633_v44 = vpop.eup %3632 }
0x2ab2   :  { %v1887_v47 = vmul.f32 %v3633_v44, %v1885_v5 }
0x2b15   :  { %v1890_v45 = vpop.permute.xlu1 %1889 }
0x2b16   :  { %v1892_v46 = vmul.f32 %v3633_v44, %v1890_v45 }
0x2b18   :  { %1894 = vrot.lane.b32.xlu0 %v1892_v46, %s3824_s3 }
0x2b1c   :  { %1245 = vrot.lane.b32.xlu0 %v4174_v51, %s3824_s3  ;;  %v1911_v51 = vld [vmem:[#allocation11] sm:$0xff] }
0x2b20   :  { %1467 = vrot.lane.b32.xlu0 %v4204_v29, %s3824_s3  ;;  %v1912_v29 = vld [vmem:[#allocation11 + $0x8] sm:$0xff] }
0x2b21   :  { %v3440_v54 = vpack.c.bf16 %v1912_v29, %v1911_v51 }
0x2b23   :  { %3441 = vmatprep.subr.bf16.mxu1 %v3440_v54 }
0x2b24   :  { %1794 = vrot.lane.b32.xlu0 %v1792_v28, %s3824_s3  ;;  %3443 = vmatpush3.bf16.msra.mxu1 %v3440_v54 }
0x2b25   :  { %3445 = vmatprep.subr.bf16.mxu1 %v3444_v57 }
0x2b28   :  { %3447 = vmatpush3.bf16.msra.mxu1 %v3444_v57 }
0x2b29   :  { %3454 = vmatprep.subr.bf16.mxu1 %v3825_v30 }
0x2b8a   :  { %v1895_v48 = vpop.permute.xlu0 %1894 }
0x2b8b   :  { %v1897_v49 = vadd.f32 %v1895_v48, %v1887_v47 }
0x2b8d   :  { %3634 = vtanh.f32 %v1897_v49 }
0x2b8e   :  { %v1246_v50 = vpop.permute.xlu0 %1245 }
0x2b8f   :  { %1248 = vst.msk [vmem:[#allocation2] sm:$0xc] %vm350_vm4, %v1246_v50 }
0x2b92   :  { %v1468_v14 = vpop.permute.xlu0 %1467 }
0x2b93   :  { %1470 = vst.msk [vmem:[#allocation2] sm:$0xc0] %vm574_vm5, %v1468_v14 }
0x2b96   :  { %v1795_v52 = vpop.permute.xlu0 %1794 }
0x2b97   :  { %v3635_v53 = vpop.eup %3634  ;;  %1797 = vst.msk [vmem:[#allocation2 + $0x8] sm:$0x30] %vm462_vm6, %v1795_v52 }
0x2b98   :  { %1900 = vrot.lane.b32.xlu1 %v3635_v53, %s3823_s17 }
0x2b9c   :  { %1356 = vrot.lane.b32.xlu1 %v4189_v4, %s3824_s3 }
0x2ba0   :  { %1683 = vrot.lane.b32.xlu1 %v4231_v2, %s3824_s3 }
0x2c0a   :  { %v1901_v37 = vpop.permute.xlu1 %1900 }
0x2c0b   :  { %v1903_v58 = vmul.f32 %v3633_v44, %v1901_v37 }
0x2c0d   :  { %1905 = vrot.lane.b32.xlu1 %v1903_v58, %s3824_s3 }
0x2c0e   :  { %v1357_v4 = vpop.permute.xlu1 %1356 }
0x2c0f   :  { %1359 = vst.msk [vmem:[#allocation2] sm:$0x30] %vm462_vm6, %v1357_v4 }
0x2c12   :  { %v1684_v24 = vpop.permute.xlu1 %1683 }
0x2c13   :  { %1686 = vst.msk [vmem:[#allocation2 + $0x8] sm:$0xc] %vm350_vm4, %v1684_v24 }
0x2c16   :  { %v1909_v59 = vld [vmem:[#allocation2] sm:$0xff] }
0x2c17   :  { %3245 = vmatprep.mubr.msk.f32.mxu1 %vm242_vm3, %v1909_v59 }
0x2c7f   :  { %v1906_v60 = vpop.permute.xlu1 %1905 }
0x2c80   :  { %1908 = vst.msk [vmem:[#allocation2 + $0x8] sm:$0xc0] %vm574_vm5, %v1906_v60 }
0x2c87   :  { %v1910_v61 = vld [vmem:[#allocation2 + $0x8] sm:$0xff] }
0x2c88   :  { %3246 = vmatmul.mubr.msk.f32.vlgmr.msra.gmra.mrb[16].mxu1 %vm242_vm3, %v1910_v61 }
0x2c89   :  { %3267 = vmatprep.mubr.msk.f32.mxu1 %vm3826_vm1, %v3827_v33  ;;  %3456 = vmatpush3.bf16.msra.mxu1 %v4289_v18 }
0x2c8a   :  { %3457 = vmatprep.subr.bf16.mxu1 %v3825_v30 }
0x2c8d   :  { %3459 = vmatpush3.bf16.msra.mxu1 %v4295_v20 }
0x2c8e   :  { %3466 = vmatprep.subr.bf16.mxu1 %v3825_v30 }
0x2d5b   :  { %v3247_v26 = vpop.f32.mrb[16].mxu1 }
0x2d5c   :  { %v4272_v63 = vadd.f32 %v3247_v26, %v2907_v62  ;;  %v1998_v0 = vpop.f32.mrb[17].mxu1 }
0x2d5d   :  { %v4274_v12 = vadd.f32 %v2907_v62, %v1998_v0 }
0x2d5f   :  { %3636 = vtanh.f32 %v4274_v12  ;;  %v2910_v1 = vmul.f32 -1.442695, %v4274_v12 }
0x2d61   :  { %3638 = vpow2.f32 %v2910_v1 }
0x2d69   :  { %v3637_v31 = vpop.eup %3636 }
0x2d6a   :  { %2016 = vrot.lane.b32.xlu0 %v3637_v31, %s3823_s17 }
0x2d6b   :  { %v3639_v2 = vpop.eup %3638 }
0x2d6c   :  { %v2010_v3 = vadd.f32 1.0, %v3639_v2 }
0x2d6e   :  { %3640 = vrcp.f32 %v2010_v3 }
0x2d78   :  { %v3641_v34 = vpop.eup %3640 }
0x2d79   :  { %v2014_v9 = vmul.f32 0.0, %v3641_v34 }
0x2ddc   :  { %v2017_v6 = vpop.permute.xlu0 %2016 }
0x2ddd   :  { %v2019_v8 = vmul.f32 %v3641_v34, %v2017_v6 }
0x2ddf   :  { %2021 = vrot.lane.b32.xlu1 %v2019_v8, %s3824_s3 }
0x2e51   :  { %v2022_v10 = vpop.permute.xlu1 %2021 }
0x2e52   :  { %v2024_v11 = vadd.f32 %v2022_v10, %v2014_v9 }
0x2e54   :  { %3642 = vtanh.f32 %v2024_v11  ;;  %v2118_v42 = vrot.slane %v2024_v11, 6 }
0x2e5e   :  { %v3643_v21 = vpop.eup %3642 }
0x2e5f   :  { %2027 = vrot.lane.b32.xlu0 %v3643_v21, %s3823_s17 }
0x2ed1   :  { %v2028_v22 = vpop.permute.xlu0 %2027 }
0x2ed2   :  { %v2030_v23 = vmul.f32 %v3641_v34, %v2028_v22 }
0x2ed4   :  { %2032 = vrot.lane.b32.xlu1 %v2030_v23, %s3824_s3 }
0x2f46   :  { %v2033_v25 = vpop.permute.xlu1 %2032 }
0x2f47   :  { %3257 = vmatmul.mubr.msk.f32.vlgmr.msra.gmra.mrb[16].mxu0 %vm242_vm3, %v2033_v25 }
0x2f48   :  { %3462 = vmatpush3.bf16.msra.mxu0 %v4289_v18  ;;  %3278 = vmatprep.mubr.msk.f32.mxu0 %vm3826_vm1, %v3827_v33 }
0x2f49   :  { %3463 = vmatprep.subr.bf16.mxu0 %v3825_v30 }
0x2f4c   :  { %3465 = vmatpush3.bf16.msra.mxu0 %v4295_v20 }
0x2f4d   :  { %3472 = vmatprep.subr.bf16.mxu0 %v3825_v30 }
0x301a   :  { %v2102_v27 = vpop.f32.mrb[16].mxu0 }
0x301b   :  { %v2107_v7 = vrot.slane %v2102_v27, 6  ;;  %v3258_v28 = vpop.f32.mrb[17].mxu0 }
0x301d   :  { %v2109_v32 = vadd.f32 %v2107_v7, %v4274_v12 }
0x301f   :  { %3644 = vtanh.f32 %v2109_v32  ;;  %v2912_v16 = vmul.f32 -1.442695, %v2109_v32 }
0x3021   :  { %3646 = vpow2.f32 %v2912_v16 }
0x3029   :  { %v3645_v35 = vpop.eup %3644 }
0x302a   :  { %2122 = vrot.lane.b32.xlu0 %v3645_v35, %s3823_s17 }
0x302b   :  { %v3647_v36 = vpop.eup %3646 }
0x302c   :  { %v2113_v38 = vadd.f32 1.0, %v3647_v36 }
0x302e   :  { %3648 = vrcp.f32 %v2113_v38 }
0x3038   :  { %v3649_v39 = vpop.eup %3648 }
0x3039   :  { %v2120_v43 = vmul.f32 %v3649_v39, %v2118_v42 }
0x309c   :  { %v2123_v40 = vpop.permute.xlu0 %2122 }
0x309d   :  { %v2125_v41 = vmul.f32 %v3649_v39, %v2123_v40 }
0x309f   :  { %2127 = vrot.lane.b32.xlu1 %v2125_v41, %s3824_s3 }
0x3111   :  { %v2128_v44 = vpop.permute.xlu1 %2127 }
0x3112   :  { %v2130_v45 = vadd.f32 %v2128_v44, %v2120_v43 }
0x3114   :  { %3650 = vtanh.f32 %v2130_v45  ;;  %v2225_v58 = vrot.slane %v2130_v45, 6 }
0x311e   :  { %v3651_v46 = vpop.eup %3650 }
0x311f   :  { %2133 = vrot.lane.b32.xlu0 %v3651_v46, %s3823_s17 }
0x3191   :  { %v2134_v5 = vpop.permute.xlu0 %2133 }
0x3192   :  { %v2136_v47 = vmul.f32 %v3649_v39, %v2134_v5 }
0x3194   :  { %v2138_v48 = vrot.slane %v2136_v47, 2 }
0x3196   :  { %2139 = vrot.lane.b32.xlu1 %v2138_v48, %s3824_s3 }
0x3208   :  { %v2140_v49 = vpop.permute.xlu1 %2139 }
0x3209   :  { %3268 = vmatmul.mubr.msk.f32.vlgmr.msra.gmra.mrb[18].mxu1 %vm242_vm3, %v2140_v49 }
0x320a   :  { %3468 = vmatpush3.bf16.msra.mxu1 %v4289_v18  ;;  %3289 = vmatprep.mubr.msk.f32.mxu1 %vm3826_vm1, %v3827_v33 }
0x320b   :  { %3469 = vmatprep.subr.bf16.mxu1 %v3825_v30 }
0x320e   :  { %3471 = vmatpush3.bf16.msra.mxu1 %v4295_v20 }
0x320f   :  { %3478 = vmatprep.subr.bf16.mxu1 %v3825_v30 }
0x32dc   :  { %v2209_v50 = vpop.f32.mrb[18].mxu1 }
0x32dd   :  { %v2214_v14 = vrot.slane %v2209_v50, 4  ;;  %v3269_v52 = vpop.f32.mrb[19].mxu1 }
0x32df   :  { %v2216_v53 = vadd.f32 %v2214_v14, %v4274_v12 }
0x32e1   :  { %3652 = vtanh.f32 %v2216_v53  ;;  %v2914_v29 = vmul.f32 -1.442695, %v2216_v53 }
0x32e3   :  { %3654 = vpow2.f32 %v2914_v29 }
0x32eb   :  { %v3653_v51 = vpop.eup %3652 }
0x32ec   :  { %2229 = vrot.lane.b32.xlu0 %v3653_v51, %s3823_s17 }
0x32ed   :  { %v3655_v54 = vpop.eup %3654 }
0x32ee   :  { %v2220_v55 = vadd.f32 1.0, %v3655_v54 }
0x32f0   :  { %3656 = vrcp.f32 %v2220_v55 }
0x32fa   :  { %v3657_v56 = vpop.eup %3656 }
0x32fb   :  { %v2227_v4 = vmul.f32 %v3657_v56, %v2225_v58 }
0x335e   :  { %v2230_v57 = vpop.permute.xlu0 %2229 }
0x335f   :  { %v2232_v37 = vmul.f32 %v3657_v56, %v2230_v57 }
0x3361   :  { %2234 = vrot.lane.b32.xlu1 %v2232_v37, %s3824_s3 }
0x33d3   :  { %v2235_v24 = vpop.permute.xlu1 %2234 }
0x33d4   :  { %v2237_v59 = vadd.f32 %v2235_v24, %v2227_v4 }
0x33d6   :  { %3658 = vtanh.f32 %v2237_v59  ;;  %v2332_v15 = vrot.slane %v2237_v59, 6 }
0x33e0   :  { %v3659_v60 = vpop.eup %3658 }
0x33e1   :  { %2240 = vrot.lane.b32.xlu0 %v3659_v60, %s3823_s17 }
0x3453   :  { %v2241_v61 = vpop.permute.xlu0 %2240 }
0x3454   :  { %v2243_v62 = vmul.f32 %v3657_v56, %v2241_v61 }
0x3456   :  { %v2245_v26 = vrot.slane %v2243_v62, 4 }
0x3458   :  { %2246 = vrot.lane.b32.xlu1 %v2245_v26, %s3824_s3 }
0x34ca   :  { %v2247_v0 = vpop.permute.xlu1 %2246 }
0x34cb   :  { %3279 = vmatmul.mubr.msk.f32.vlgmr.msra.gmra.mrb[18].mxu0 %vm242_vm3, %v2247_v0 }
0x34cc   :  { %3474 = vmatpush3.bf16.msra.mxu0 %v4289_v18  ;;  %3300 = vmatprep.mubr.msk.f32.mxu0 %vm3826_vm1, %v3827_v33 }
0x34cd   :  { %3475 = vmatprep.subr.bf16.mxu0 %v3825_v30 }
0x34d0   :  { %3477 = vmatpush3.bf16.msra.mxu0 %v4295_v20 }
0x34d1   :  { %3484 = vmatprep.subr.bf16.mxu0 %v3825_v30 }
0x359e   :  { %v2316_v31 = vpop.f32.mrb[18].mxu0 }
0x359f   :  { %v2321_v1 = vrot.slane %v2316_v31, 2  ;;  %v3280_v2 = vpop.f32.mrb[19].mxu0 }
0x35a1   :  { %v2323_v3 = vadd.f32 %v2321_v1, %v4274_v12 }
0x35a3   :  { %3660 = vtanh.f32 %v2323_v3  ;;  %v2916_v6 = vmul.f32 -1.442695, %v2323_v3 }
0x35a5   :  { %3662 = vpow2.f32 %v2916_v6 }
0x35ad   :  { %v3661_v34 = vpop.eup %3660 }
0x35ae   :  { %2336 = vrot.lane.b32.xlu0 %v3661_v34, %s3823_s17 }
0x35af   :  { %v3663_v8 = vpop.eup %3662 }
0x35b0   :  { %v2327_v9 = vadd.f32 1.0, %v3663_v8 }
0x35b2   :  { %3664 = vrcp.f32 %v2327_v9 }
0x35bc   :  { %v3665_v10 = vpop.eup %3664 }
0x35bd   :  { %v2334_v17 = vmul.f32 %v3665_v10, %v2332_v15 }
0x3620   :  { %v2337_v11 = vpop.permute.xlu0 %2336 }
0x3621   :  { %v2339_v13 = vmul.f32 %v3665_v10, %v2337_v11 }
0x3623   :  { %2341 = vrot.lane.b32.xlu1 %v2339_v13, %s3824_s3 }
0x3695   :  { %v2342_v19 = vpop.permute.xlu1 %2341 }
0x3696   :  { %v2344_v21 = vadd.f32 %v2342_v19, %v2334_v17 }
0x3698   :  { %3666 = vtanh.f32 %v2344_v21  ;;  %v2436_v42 = vrot.slane %v2344_v21, 6 }
0x36a2   :  { %v3667_v12 = vpop.eup %3666 }
0x36a3   :  { %2347 = vrot.lane.b32.xlu0 %v3667_v12, %s3823_s17 }
0x3715   :  { %v2348_v22 = vpop.permute.xlu0 %2347 }
0x3716   :  { %v2350_v23 = vmul.f32 %v3665_v10, %v2348_v22 }
0x3718   :  { %v2352_v25 = vrot.slane %v2350_v23, 6 }
0x371a   :  { %2353 = vrot.lane.b32.xlu1 %v2352_v25, %s3824_s3 }
0x378c   :  { %v2354_v27 = vpop.permute.xlu1 %2353 }
0x378d   :  { %3290 = vmatmul.mubr.msk.f32.vlgmr.msra.gmra.mrb[20].mxu1 %vm242_vm3, %v2354_v27 }
0x378e   :  { %3480 = vmatpush3.bf16.msra.mxu1 %v4289_v18  ;;  %3311 = vmatprep.mubr.msk.f32.mxu1 %vm3826_vm1, %v3827_v33 }
0x378f   :  { %3481 = vmatprep.subr.bf16.mxu1 %v3825_v30 }
0x3792   :  { %3483 = vmatpush3.bf16.msra.mxu1 %v4295_v20 }
0x3793   :  { %3490 = vmatprep.subr.bf16.mxu1 %v3825_v30 }
0x3860   :  { %v2423_v7 = vpop.f32.mrb[20].mxu1 }
0x3861   :  { %v2427_v28 = vadd.f32 %v2423_v7, %v4272_v63  ;;  %v3291_v32 = vpop.f32.mrb[21].mxu1 }
0x3863   :  { %3668 = vtanh.f32 %v2427_v28  ;;  %v2918_v16 = vmul.f32 -1.442695, %v2427_v28 }
0x3865   :  { %3670 = vpow2.f32 %v2918_v16 }
0x386d   :  { %v3669_v35 = vpop.eup %3668 }
0x386e   :  { %2440 = vrot.lane.b32.xlu0 %v3669_v35, %s3823_s17 }
0x386f   :  { %v3671_v36 = vpop.eup %3670 }
0x3870   :  { %v2431_v38 = vadd.f32 1.0, %v3671_v36 }
0x3872   :  { %3672 = vrcp.f32 %v2431_v38 }
0x387c   :  { %v3673_v39 = vpop.eup %3672 }
0x387d   :  { %v2438_v43 = vmul.f32 %v3673_v39, %v2436_v42 }
0x38e0   :  { %v2441_v40 = vpop.permute.xlu0 %2440 }
0x38e1   :  { %v2443_v41 = vmul.f32 %v3673_v39, %v2441_v40 }
0x38e3   :  { %2445 = vrot.lane.b32.xlu1 %v2443_v41, %s3824_s3 }
0x3955   :  { %v2446_v44 = vpop.permute.xlu1 %2445 }
0x3956   :  { %v2448_v45 = vadd.f32 %v2446_v44, %v2438_v43  ;;  %v2776_v43 = vld [vmem:[%s4406_s10 + $0x8] sm:$0xff]  ;;  %v2777_v44 = vld [vmem:[%s4406_s10 + $0x10] sm:$0xff] }
0x3958   :  { %3674 = vtanh.f32 %v2448_v45 }
0x3962   :  { %v3675_v46 = vpop.eup %3674 }
0x3963   :  { %2451 = vrot.lane.b32.xlu0 %v3675_v46, %s3823_s17  ;;  %v2778_v46 = vld [vmem:[%s4406_s10 + $0x18] sm:$0xff] }
0x39d5   :  { %v2452_v5 = vpop.permute.xlu0 %2451 }
0x39d6   :  { %v2454_v47 = vmul.f32 %v3673_v39, %v2452_v5  ;;  %v3494_v5 = vpack.c.bf16 %v2778_v46, %v2777_v44 }
0x39d8   :  { %2456 = vrot.lane.b32.xlu1 %v2454_v47, %s3824_s3 }
0x3a4a   :  { %v2457_v48 = vpop.permute.xlu1 %2456 }
0x3a4b   :  { %3301 = vmatmul.mubr.msk.f32.vlgmr.msra.gmra.mrb[20].mxu0 %vm242_vm3, %v2457_v48 }
0x3a4c   :  { %3486 = vmatpush3.bf16.msra.mxu0 %v4289_v18  ;;  %3322 = vmatprep.mubr.msk.f32.mxu0 %vm3826_vm1, %v3827_v33 }
0x3a4d   :  { %3487 = vmatprep.subr.bf16.mxu0 %v3825_v30 }
0x3a50   :  { %3489 = vmatpush3.bf16.msra.mxu0 %v4295_v20  ;;  %v2542_v20 = vrot.slane %v2448_v45, 6 }
0x3b1e   :  { %v2526_v49 = vpop.f32.mrb[20].mxu0 }
0x3b1f   :  { %v2531_v50 = vrot.slane %v2526_v49, 6  ;;  %v3302_v14 = vpop.f32.mrb[21].mxu0 }
0x3b21   :  { %v2533_v52 = vadd.f32 %v2531_v50, %v4272_v63 }
0x3b23   :  { %3676 = vtanh.f32 %v2533_v52  ;;  %v2920_v51 = vmul.f32 -1.442695, %v2533_v52  ;;  %v2925_v52 = vld [vmem:[#allocation3] ss:$0 sm:$0xff] }
0x3b25   :  { %3678 = vpow2.f32 %v2920_v51 }
0x3b2d   :  { %v3677_v53 = vpop.eup %3676 }
0x3b2e   :  { %2546 = vrot.lane.b32.xlu0 %v3677_v53, %s3823_s17 }
0x3b2f   :  { %v3679_v29 = vpop.eup %3678 }
0x3b30   :  { %v2537_v18 = vadd.f32 1.0, %v3679_v29 }
0x3b32   :  { %3680 = vrcp.f32 %v2537_v18 }
0x3b3c   :  { %v3681_v54 = vpop.eup %3680 }
0x3b3d   :  { %v2544_v57 = vmul.f32 %v3681_v54, %v2542_v20 }
0x3ba0   :  { %v2547_v55 = vpop.permute.xlu0 %2546 }
0x3ba1   :  { %v2549_v56 = vmul.f32 %v3681_v54, %v2547_v55 }
0x3ba3   :  { %2551 = vrot.lane.b32.xlu1 %v2549_v56, %s3824_s3 }
0x3c15   :  { %v2552_v37 = vpop.permute.xlu1 %2551 }
0x3c16   :  { %v2554_v58 = vadd.f32 %v2552_v37, %v2544_v57 }
0x3c18   :  { %3682 = vtanh.f32 %v2554_v58 }
0x3c22   :  { %v3683_v4 = vpop.eup %3682 }
0x3c23   :  { %2557 = vrot.lane.b32.xlu0 %v3683_v4, %s3823_s17 }
0x3c95   :  { %v2558_v24 = vpop.permute.xlu0 %2557 }
0x3c96   :  { %v2560_v59 = vmul.f32 %v3681_v54, %v2558_v24 }
0x3c98   :  { %v2562_v60 = vrot.slane %v2560_v59, 2 }
0x3c9a   :  { %2563 = vrot.lane.b32.xlu1 %v2562_v60, %s3824_s3 }
0x3d0c   :  { %v2564_v61 = vpop.permute.xlu1 %2563 }
0x3d0d   :  { %3312 = vmatmul.mubr.msk.f32.vlgmr.msra.gmra.mrb[22].mxu1 %vm242_vm3, %v2564_v61 }
0x3d0e   :  { %3333 = vmatprep.mubr.msk.f32.mxu1 %vm3826_vm1, %v3827_v33  ;;  %v2649_v33 = vrot.slane %v2554_v58, 6 }
0x3de0   :  { %v2633_v62 = vpop.f32.mrb[22].mxu1 }
0x3de1   :  { %v2638_v26 = vrot.slane %v2633_v62, 4  ;;  %v3313_v0 = vpop.f32.mrb[23].mxu1 }
0x3de3   :  { %v2640_v31 = vadd.f32 %v2638_v26, %v4272_v63 }
0x3de5   :  { %3684 = vtanh.f32 %v2640_v31  ;;  %v2922_v2 = vmul.f32 -1.442695, %v2640_v31 }
0x3de7   :  { %3686 = vpow2.f32 %v2922_v2 }
0x3def   :  { %v3685_v1 = vpop.eup %3684 }
0x3df0   :  { %2653 = vrot.lane.b32.xlu0 %v3685_v1, %s3823_s17 }
0x3df1   :  { %v3687_v3 = vpop.eup %3686 }
0x3df2   :  { %v2644_v34 = vadd.f32 1.0, %v3687_v3 }
0x3df4   :  { %3688 = vrcp.f32 %v2644_v34 }
0x3dfe   :  { %v3689_v6 = vpop.eup %3688 }
0x3dff   :  { %v2651_v10 = vmul.f32 %v3689_v6, %v2649_v33 }
0x3e62   :  { %v2654_v8 = vpop.permute.xlu0 %2653 }
0x3e63   :  { %v2656_v9 = vmul.f32 %v3689_v6, %v2654_v8 }
0x3e65   :  { %2658 = vrot.lane.b32.xlu1 %v2656_v9, %s3824_s3 }
0x3ed7   :  { %v2659_v11 = vpop.permute.xlu1 %2658 }
0x3ed8   :  { %v2661_v13 = vadd.f32 %v2659_v11, %v2651_v10 }
0x3eda   :  { %3690 = vtanh.f32 %v2661_v13  ;;  %v2756_v39 = vrot.slane %v2661_v13, 6 }
0x3ee4   :  { %v3691_v15 = vpop.eup %3690 }
0x3ee5   :  { %2664 = vrot.lane.b32.xlu0 %v3691_v15, %s3823_s17 }
0x3f57   :  { %v2665_v17 = vpop.permute.xlu0 %2664 }
0x3f58   :  { %v2667_v19 = vmul.f32 %v3689_v6, %v2665_v17 }
0x3f5a   :  { %v2669_v21 = vrot.slane %v2667_v19, 4 }
0x3f5c   :  { %2670 = vrot.lane.b32.xlu1 %v2669_v21, %s3824_s3 }
0x3fce   :  { %v2671_v12 = vpop.permute.xlu1 %2670 }
0x3fcf   :  { %3323 = vmatmul.mubr.msk.f32.vlgmr.msra.gmra.mrb[22].mxu0 %vm242_vm3, %v2671_v12 }
0x40a2   :  { %v2740_v22 = vpop.f32.mrb[22].mxu0 }
0x40a3   :  { %v2745_v23 = vrot.slane %v2740_v22, 2  ;;  %v3324_v25 = vpop.f32.mrb[23].mxu0 }
0x40a5   :  { %v2747_v27 = vadd.f32 %v2745_v23, %v4272_v63  ;;  %v2775_v63 = vld [vmem:[%s4406_s10] sm:$0xff] }
0x40a6   :  { %v3491_v45 = vpack.c.bf16 %v2776_v43, %v2775_v63 }
0x40a7   :  { %3692 = vtanh.f32 %v2747_v27  ;;  %v2924_v28 = vmul.f32 -1.442695, %v2747_v27 }
0x40a8   :  { %3492 = vmatpush3.bf16.msra.mxu1 %v3491_v45 }
0x40a9   :  { %3694 = vpow2.f32 %v2924_v28  ;;  %3493 = vmatprep.subr.bf16.mxu1 %v3825_v30 }
0x40ac   :  { %3495 = vmatpush3.bf16.msra.mxu1 %v3494_v5 }
0x40b1   :  { %v3693_v7 = vpop.eup %3692 }
0x40b2   :  { %2760 = vrot.lane.b32.xlu0 %v3693_v7, %s3823_s17 }
0x40b3   :  { %v3695_v32 = vpop.eup %3694 }
0x40b4   :  { %v2751_v35 = vadd.f32 1.0, %v3695_v32 }
0x40b6   :  { %3696 = vrcp.f32 %v2751_v35 }
0x40c0   :  { %v3697_v16 = vpop.eup %3696 }
0x40c1   :  { %v2758_v40 = vmul.f32 %v3697_v16, %v2756_v39 }
0x4124   :  { %v2761_v36 = vpop.permute.xlu0 %2760 }
0x4125   :  { %v2763_v38 = vmul.f32 %v3697_v16, %v2761_v36 }
0x4127   :  { %2765 = vrot.lane.b32.xlu1 %v2763_v38, %s3824_s3 }
0x4199   :  { %v2766_v41 = vpop.permute.xlu1 %2765 }
0x419a   :  { %v2768_v42 = vadd.f32 %v2766_v41, %v2758_v40 }
0x419c   :  { %3698 = vtanh.f32 %v2768_v42 }
0x41a6   :  { %v3699_v47 = vpop.eup %3698 }
0x41a7   :  { %2771 = vrot.lane.b32.xlu0 %v3699_v47, %s3823_s17 }
0x4219   :  { %v2772_v48 = vpop.permute.xlu0 %2771 }
0x421a   :  { %v2774_v49 = vmul.f32 %v3697_v16, %v2772_v48 }
0x421c   :  { %v2787_v50 = vrot.slane %v2774_v49, 6 }
0x421e   :  { %2788 = vrot.lane.b32.xlu1 %v2787_v50, %s3824_s3 }
0x4290   :  { %v2789_v14 = vpop.permute.xlu1 %2788 }
0x4291   :  { %3334 = vmatmul.mubr.msk.f32.vlgmr.msra.gmra.mrb[24].mxu1 %vm242_vm3, %v2789_v14 }
0x4364   :  { %v2858_v53 = vpop.f32.mrb[24].mxu1 }
0x4365   :  { %v2859_v51 = vadd.f32 %v2925_v52, %v2858_v53  ;;  %v3335_v29 = vpop.f32.mrb[25].mxu1 }
0x4367   :  { %2863 = vst.msk [vmem:[%s4408_s12] sm:$0x3] %vm2862_vm7, %v2859_v51 }
0x4368   :  { %2868 = vsyncpa [#allocation5], 1 }
0x4369   :  { %2869 = vsyncpa [#allocation7], 1 }
0x436a   :  { %2870 = vsyncpa [#allocation10], 1 }

</bundles_post_ra>
